<compile_context>
chip_gen: v7x
topology: tpu7x:2x2x1
jax: 0.10.0
libtpu: 0.0.40
codegen_flags: <defaults>
</compile_context>

<pallas_src>
import functools

import jax
import jax.numpy as jnp
import numpy as np
from jax.experimental import pallas as pl
from jax.experimental.pallas import tpu as pltpu

ALPHA = 0.05   # LeakyReLU negative slope used by the module
               # TODO(synk): nn.LeakyReLU default is 0.01; verify against the
               #             actually injected conv_block.
N_OUT = 64     # fc_block output width (TripletLossModelOld default n_out)
FLAT = 22 * 2 * 2          # 88 flattened conv features per sample
BLOCK_B = 8                # samples per grid tile (multiple of 8; 8..64 fit VMEM)


# ---------------- constant gather tensors (module-level, numpy) ----------------

def _build_sel1():
    """(25, 256, 16): per-tap gather for conv1 (16x16, pad2, stride4, k5 -> 4x4)."""
    sel = np.zeros((25, 256, 16), np.float32)
    for kh in range(5):
        for kw in range(5):
            t = kh * 5 + kw
            for oh in range(4):
                for ow in range(4):
                    ih, iw = 4 * oh + kh - 2, 4 * ow + kw - 2
                    if 0 <= ih < 16 and 0 <= iw < 16:
                        sel[t, ih * 16 + iw, oh * 4 + ow] = 1.0
    return sel


def _build_g2():
    """(9, 16, 4, 4): per-tap gather for conv2 (4x4, pad1, k3), indexed
    [tap, input_pos, pool_offset q=dh*2+dw, pooled_pos s=ph*2+pw]."""
    g = np.zeros((9, 16, 4, 4), np.float32)
    for kh in range(3):
        for kw in range(3):
            t = kh * 3 + kw
            for ph in range(2):
                for pw in range(2):
                    for dh in range(2):
                        for dw in range(2):
                            oh, ow = 2 * ph + dh, 2 * pw + dw
                            ih, iw = oh + kh - 1, ow + kw - 1
                            if 0 <= ih < 4 and 0 <= iw < 4:
                                g[t, ih * 4 + iw, dh * 2 + dw, ph * 2 + pw] = 1.0
    return g


_SEL1 = _build_sel1()
_G2 = _build_g2()


# -------------------------------- Pallas kernel --------------------------------

def _fused_forward_kernel(p0_ref, w0bd_ref, b0_ref,
                          w1_ref, b1_ref, w2_ref, b2_ref,
                          wf_ref, bf_ref, out_ref, *, bsz, alpha):
    f32 = jnp.float32

    def leaky(z):
        return jnp.where(z >= 0.0, z, alpha * z)

    # conv0 (block-diagonal weight): (4B, 32B) @ (32B, 256) -> (4B, 256)
    # rows = c*B + n, lanes = conv0 spatial position (16x16).
    a0 = jnp.dot(w0bd_ref[...], p0_ref[...], preferred_element_type=f32)
    a0 = leaky(a0 + b0_ref[...])

    # conv1: dense effective weight, contracted per conv0 channel.
    # z1[n, co*16 + m] accumulates 4 matmuls (B,256)@(256,256) -> (B,256).
    z1 = jnp.dot(a0[0:bsz, :], w1_ref[pl.ds(0, 256), :],
                 preferred_element_type=f32)
    for c in range(1, 4):
        z1 = z1 + jnp.dot(a0[c * bsz:(c + 1) * bsz, :],
                          w1_ref[pl.ds(c * 256, 256), :],
                          preferred_element_type=f32)
    a1 = leaky(z1 + b1_ref[...])                                  # (B, 256)

    # conv2: one matmul, columns ordered q*128 + (co2*4 + s) (pool-offset major).
    z2 = jnp.dot(a1, w2_ref[...], preferred_element_type=f32)     # (B, 512)

    # 2x2 max-pool = elementwise max of the four aligned 128-lane groups,
    # then bias + LeakyReLU.  Valid columns: co2*4 + s for co2 < 22.
    pooled = jnp.maximum(jnp.maximum(z2[:, 0:128], z2[:, 128:256]),
                         jnp.maximum(z2[:, 256:384], z2[:, 384:512]))
    pooled = leaky(pooled + b2_ref[...])                          # (B, 128)

    # fc head: one (B,128)@(128,64) matmul, lane-dense (B, 64) store.
    out_ref[...] = (jnp.dot(pooled, wf_ref[...], preferred_element_type=f32)
                    + bf_ref[...]).astype(out_ref.dtype)


# ---------------------------------- wrapper ------------------------------------

def _im2col_conv0(x, n_pad):
    """(N,1,64,64) -> (N_pad*32, 256): rows = n*32 + tap (25 taps, zero-padded
    to 32), lanes = conv0 output position (16x16)."""
    n = x.shape[0]
    xp = jnp.pad(x, ((0, 0), (0, 0), (2, 2), (2, 2)))
    rows = [xp[:, 0, kh:kh + 64:4, kw:kw + 64:4].reshape(n, 256)
            for kh in range(5) for kw in range(5)]
    p = jnp.stack(rows, axis=1)                                    # (N, 25, 256)
    p = jnp.pad(p, ((0, n_pad - n), (0, 7), (0, 0)))               # (N_pad, 32, 256)
    return p.reshape(n_pad * 32, 256)


def _pack_params(p, bsz):
    """Tiny per-call weight repacks (XLA, fused under jit; weights only)."""
    f32 = jnp.float32
    # conv0: block-diagonal (4B, 32B), rows c*B+n, cols n*32+tap.
    w0p = jnp.pad(p["w0"].reshape(4, 25), ((0, 0), (0, 7)))        # (4, 32)
    w0bd = jnp.einsum("ct,nm->cnmt", w0p, jnp.eye(bsz, dtype=f32))
    w0bd = w0bd.reshape(4 * bsz, bsz * 32)
    b0col = jnp.repeat(p["b0"], bsz).reshape(4 * bsz, 1)

    # conv1 effective weight: (1024, 256), rows c*256+pos, cols co1*16+m.
    w1r = p["w1"].reshape(16, 4, 25)
    w1eff = jnp.einsum("oct,tpm->cpom", w1r, jnp.asarray(_SEL1)).reshape(1024, 256)
    b1row = jnp.repeat(p["b1"], 16).reshape(1, 256)

    # conv2 effective weight: (256, 512), rows c1*16+m1, cols q*128 + (co2*4+s).
    w2r = p["w2"].reshape(22, 16, 9)
    w2eff = jnp.einsum("oct,tmqs->cmqos", w2r, jnp.asarray(_G2)).reshape(256, 4, 88)
    w2eff = jnp.pad(w2eff, ((0, 0), (0, 0), (0, 40))).reshape(256, 512)
    b2row = jnp.pad(jnp.repeat(p["b2"], 4), (0, 40)).reshape(1, 128)

    # fc head: (128, 64) with zero rows for the padded 88->128 features.
    wfp = jnp.pad(p["wf"].T, ((0, 40), (0, 0)))                    # (128, 64)
    bfrow = p["bf"].reshape(1, N_OUT)
    return w0bd, b0col, w1eff, b1row, w2eff, b2row, wfp, bfrow


def forward(x, p):
    """TripletLossModelOld.forward — single fused Pallas kernel, batch-gridded."""
    n = x.shape[0]
    bsz = BLOCK_B
    n_pad = ((n + bsz - 1) // bsz) * bsz
    p0 = _im2col_conv0(x, n_pad)
    w0bd, b0col, w1eff, b1row, w2eff, b2row, wfp, bfrow = _pack_params(p, bsz)

    out_full = pl.pallas_call(
        functools.partial(_fused_forward_kernel, bsz=bsz, alpha=ALPHA),
        out_shape=jax.ShapeDtypeStruct((n_pad, N_OUT), jnp.float32),
        grid=(n_pad // bsz,),
        in_specs=[
            pl.BlockSpec((bsz * 32, 256), lambda i: (i, 0)),    # p0 (tiled by batch)
            pl.BlockSpec((4 * bsz, 32 * bsz), lambda i: (0, 0)),  # w0bd
            pl.BlockSpec((4 * bsz, 1), lambda i: (0, 0)),         # b0col
            pl.BlockSpec((1024, 256), lambda i: (0, 0)),          # w1eff
            pl.BlockSpec((1, 256), lambda i: (0, 0)),             # b1row
            pl.BlockSpec((256, 512), lambda i: (0, 0)),           # w2eff
            pl.BlockSpec((1, 128), lambda i: (0, 0)),             # b2row
            pl.BlockSpec((128, N_OUT), lambda i: (0, 0)),         # wfp
            pl.BlockSpec((1, N_OUT), lambda i: (0, 0)),           # bfrow
        ],
        out_specs=pl.BlockSpec((bsz, N_OUT), lambda i: (i, 0)),
        compiler_params=pltpu.CompilerParams(
            dimension_semantics=("parallel",)),
    )(p0, w0bd, b0col, w1eff, b1row, w2eff, b2row, wfp, bfrow)
    return out_full[:n]                                            # (N, 64)


# ------------------------------ parameter init ---------------------------------
# reset_parameters(): weight ~ U(-1/sqrt(fan), 1/sqrt(fan)) with
# fan = weight.size()[0] (= out_channels / out_features), bias = 0.

def init_params(key):
    def uni(k, shape, fan):
        lim = 1.0 / np.sqrt(fan)
        return jax.random.uniform(k, shape, jnp.float32, -lim, lim)

    k0, k1, k2, k3 = jax.random.split(key, 4)
    return {
        "w0": uni(k0, (4, 1, 5, 5), 4),      "b0": jnp.zeros((4,), jnp.float32),
        "w1": uni(k1, (16, 4, 5, 5), 16),    "b1": jnp.zeros((16,), jnp.float32),
        "w2": uni(k2, (22, 16, 3, 3), 22),   "b2": jnp.zeros((22,), jnp.float32),
        "wf": uni(k3, (N_OUT, FLAT), N_OUT), "bf": jnp.zeros((N_OUT,), jnp.float32),
    }


# --------------------------------- reference ------------------------------------

def ref_forward(x, p):
    def conv(x, w, b, s, pad):
        y = jax.lax.conv_general_dilated(
            x, w, (s, s), [(pad, pad), (pad, pad)],
            dimension_numbers=("NCHW", "OIHW", "NCHW"))
        return y + b.reshape(1, -1, 1, 1)

    def lrelu(z):
        return jnp.where(z >= 0, z, ALPHA * z)

    y = lrelu(conv(x, p["w0"], p["b0"], 4, 2))
    y = lrelu(conv(y, p["w1"], p["b1"], 4, 2))
    y = conv(y, p["w2"], p["b2"], 1, 1)
    y = jax.lax.reduce_window(y, -jnp.inf, jax.lax.max,
                              (1, 1, 2, 2), (1, 1, 2, 2), "VALID")
    y = lrelu(y)
    y = y.reshape(y.shape[0], -1)                     # (N, 88), NCHW flatten order
    return y @ p["wf"].T + p["bf"]                    # (N, 64)


# ----------------------------------- main ----------------------------------------

if __name__ == "__main__":
    key = jax.random.PRNGKey(0)
    kp, kx, kx2 = jax.random.split(key, 3)
    params = init_params(kp)
    fwd = jax.jit(forward)

    # NCHW input, single channel, 64x64 (module expects Conv2d(1, ...)).
    x = jax.random.normal(kx, (2, 1, 64, 64), dtype=jnp.float32)
    out = jax.block_until_ready(fwd(x, params))
    ref = jax.block_until_ready(ref_forward(x, params))
    assert out.shape == (2, N_OUT), out.shape
    np.testing.assert_allclose(np.asarray(out), np.asarray(ref),
                               rtol=1e-4, atol=1e-4)

    # Extra check: batch not a multiple of the tile -> multi-tile grid + padding.
    x2 = jax.random.normal(kx2, (9, 1, 64, 64), dtype=jnp.float32)
    out2 = jax.block_until_ready(fwd(x2, params))
    ref2 = jax.block_until_ready(ref_forward(x2, params))
    np.testing.assert_allclose(np.asarray(out2), np.asarray(ref2),
                               rtol=1e-4, atol=1e-4)

    print("KERNEL_OK")
</pallas_src>

<mosaic_0001>
module attributes {stable_mosaic.version = 11 : i64} {
  func.func @_fused_forward_kernel(%arg0: i32, %arg1: memref<256x256xf32, #tpu.memory_space<vmem>>, %arg2: memref<32x256xf32, #tpu.memory_space<vmem>>, %arg3: memref<32x1xf32, #tpu.memory_space<vmem>>, %arg4: memref<1024x256xf32, #tpu.memory_space<vmem>>, %arg5: memref<1x256xf32, #tpu.memory_space<vmem>>, %arg6: memref<256x512xf32, #tpu.memory_space<vmem>>, %arg7: memref<1x128xf32, #tpu.memory_space<vmem>>, %arg8: memref<128x64xf32, #tpu.memory_space<vmem>>, %arg9: memref<1x64xf32, #tpu.memory_space<vmem>>, %arg10: memref<8x64xf32, #tpu.memory_space<vmem>>) attributes {dimension_semantics = [#tpu.dimension_semantics<parallel>], iteration_bounds = array<i64: 1>, scalar_prefetch = 0 : i64, scratch_operands = 0 : i64, tpu.core_type = #tpu.core_type<tc>, window_params = [{transform_indices = @transform_0, window_bounds = array<i64: 256, 256>}, {pipeline_mode = #tpu.pipeline_mode<synchronous>, transform_indices = @transform_1, window_bounds = array<i64: 32, 256>}, {pipeline_mode = #tpu.pipeline_mode<synchronous>, transform_indices = @transform_2, window_bounds = array<i64: 32, 1>}, {pipeline_mode = #tpu.pipeline_mode<synchronous>, transform_indices = @transform_3, window_bounds = array<i64: 1024, 256>}, {pipeline_mode = #tpu.pipeline_mode<synchronous>, transform_indices = @transform_4, window_bounds = array<i64: 1, 256>}, {pipeline_mode = #tpu.pipeline_mode<synchronous>, transform_indices = @transform_5, window_bounds = array<i64: 256, 512>}, {pipeline_mode = #tpu.pipeline_mode<synchronous>, transform_indices = @transform_6, window_bounds = array<i64: 1, 128>}, {pipeline_mode = #tpu.pipeline_mode<synchronous>, transform_indices = @transform_7, window_bounds = array<i64: 128, 64>}, {pipeline_mode = #tpu.pipeline_mode<synchronous>, transform_indices = @transform_8, window_bounds = array<i64: 1, 64>}, {transform_indices = @transform_9, window_bounds = array<i64: 8, 64>}]} {
    %c0 = arith.constant 0 : index
    %c0_0 = arith.constant 0 : index
    %0 = vector.load %arg2[%c0, %c0_0] : memref<32x256xf32, #tpu.memory_space<vmem>>, vector<32x256xf32>
    %c0_1 = arith.constant 0 : index
    %c0_2 = arith.constant 0 : index
    %1 = vector.load %arg1[%c0_1, %c0_2] : memref<256x256xf32, #tpu.memory_space<vmem>>, vector<256x256xf32>
    %cst = arith.constant dense<0.000000e+00> : vector<32x256xf32>
    %2 = tpu.matmul %0, %1, %cst {dimension_numbers = #tpu.dot_dimension_numbers<[1], [0], [0], [1], [0, 0, 1, 1], [], []>} : vector<32x256xf32>, vector<256x256xf32>, vector<32x256xf32> -> vector<32x256xf32>
    %c0_3 = arith.constant 0 : index
    %c0_4 = arith.constant 0 : index
    %3 = vector.load %arg3[%c0_3, %c0_4] : memref<32x1xf32, #tpu.memory_space<vmem>>, vector<32x1xf32>
    %4 = vector.broadcast %3 : vector<32x1xf32> to vector<32x256xf32>
    %5 = arith.addf %2, %4 : vector<32x256xf32>
    %cst_5 = arith.constant 0.000000e+00 : f32
    %6 = vector.broadcast %cst_5 : f32 to vector<32x256xf32>
    %7 = arith.cmpf oge, %5, %6 : vector<32x256xf32>
    %cst_6 = arith.constant 5.000000e-02 : f32
    %8 = vector.broadcast %cst_6 : f32 to vector<32x256xf32>
    %9 = arith.mulf %8, %5 : vector<32x256xf32>
    %10 = arith.select %7, %5, %9 : vector<32x256xi1>, vector<32x256xf32>
    %11 = vector.extract_strided_slice %10 {offsets = [0, 0], sizes = [8, 256], strides = [1, 1]} : vector<32x256xf32> to vector<8x256xf32>
    %c0_7 = arith.constant 0 : index
    %c0_8 = arith.constant 0 : index
    %12 = vector.load %arg4[%c0_7, %c0_8] : memref<1024x256xf32, #tpu.memory_space<vmem>>, vector<256x256xf32>
    %cst_9 = arith.constant dense<0.000000e+00> : vector<8x256xf32>
    %13 = tpu.matmul %11, %12, %cst_9 {dimension_numbers = #tpu.dot_dimension_numbers<[1], [0], [0], [1], [0, 0, 1, 1], [], []>} : vector<8x256xf32>, vector<256x256xf32>, vector<8x256xf32> -> vector<8x256xf32>
    %14 = vector.extract_strided_slice %10 {offsets = [8, 0], sizes = [8, 256], strides = [1, 1]} : vector<32x256xf32> to vector<8x256xf32>
    %c256 = arith.constant 256 : index
    %c0_10 = arith.constant 0 : index
    %15 = vector.load %arg4[%c256, %c0_10] : memref<1024x256xf32, #tpu.memory_space<vmem>>, vector<256x256xf32>
    %cst_11 = arith.constant dense<0.000000e+00> : vector<8x256xf32>
    %16 = tpu.matmul %14, %15, %cst_11 {dimension_numbers = #tpu.dot_dimension_numbers<[1], [0], [0], [1], [0, 0, 1, 1], [], []>} : vector<8x256xf32>, vector<256x256xf32>, vector<8x256xf32> -> vector<8x256xf32>
    %17 = arith.addf %13, %16 : vector<8x256xf32>
    %18 = vector.extract_strided_slice %10 {offsets = [16, 0], sizes = [8, 256], strides = [1, 1]} : vector<32x256xf32> to vector<8x256xf32>
    %c512 = arith.constant 512 : index
    %c0_12 = arith.constant 0 : index
    %19 = vector.load %arg4[%c512, %c0_12] : memref<1024x256xf32, #tpu.memory_space<vmem>>, vector<256x256xf32>
    %cst_13 = arith.constant dense<0.000000e+00> : vector<8x256xf32>
    %20 = tpu.matmul %18, %19, %cst_13 {dimension_numbers = #tpu.dot_dimension_numbers<[1], [0], [0], [1], [0, 0, 1, 1], [], []>} : vector<8x256xf32>, vector<256x256xf32>, vector<8x256xf32> -> vector<8x256xf32>
    %21 = arith.addf %17, %20 : vector<8x256xf32>
    %22 = vector.extract_strided_slice %10 {offsets = [24, 0], sizes = [8, 256], strides = [1, 1]} : vector<32x256xf32> to vector<8x256xf32>
    %c768 = arith.constant 768 : index
    %c0_14 = arith.constant 0 : index
    %23 = vector.load %arg4[%c768, %c0_14] : memref<1024x256xf32, #tpu.memory_space<vmem>>, vector<256x256xf32>
    %cst_15 = arith.constant dense<0.000000e+00> : vector<8x256xf32>
    %24 = tpu.matmul %22, %23, %cst_15 {dimension_numbers = #tpu.dot_dimension_numbers<[1], [0], [0], [1], [0, 0, 1, 1], [], []>} : vector<8x256xf32>, vector<256x256xf32>, vector<8x256xf32> -> vector<8x256xf32>
    %25 = arith.addf %21, %24 : vector<8x256xf32>
    %c0_16 = arith.constant 0 : index
    %c0_17 = arith.constant 0 : index
    %26 = vector.load %arg5[%c0_16, %c0_17] : memref<1x256xf32, #tpu.memory_space<vmem>>, vector<1x256xf32>
    %27 = vector.broadcast %26 : vector<1x256xf32> to vector<8x256xf32>
    %28 = arith.addf %25, %27 : vector<8x256xf32>
    %cst_18 = arith.constant 0.000000e+00 : f32
    %29 = vector.broadcast %cst_18 : f32 to vector<8x256xf32>
    %30 = arith.cmpf oge, %28, %29 : vector<8x256xf32>
    %cst_19 = arith.constant 5.000000e-02 : f32
    %31 = vector.broadcast %cst_19 : f32 to vector<8x256xf32>
    %32 = arith.mulf %31, %28 : vector<8x256xf32>
    %33 = arith.select %30, %28, %32 : vector<8x256xi1>, vector<8x256xf32>
    %c0_20 = arith.constant 0 : index
    %c0_21 = arith.constant 0 : index
    %34 = vector.load %arg6[%c0_20, %c0_21] : memref<256x512xf32, #tpu.memory_space<vmem>>, vector<256x512xf32>
    %cst_22 = arith.constant dense<0.000000e+00> : vector<8x512xf32>
    %35 = tpu.matmul %33, %34, %cst_22 {dimension_numbers = #tpu.dot_dimension_numbers<[1], [0], [0], [1], [0, 0, 1, 1], [], []>} : vector<8x256xf32>, vector<256x512xf32>, vector<8x512xf32> -> vector<8x512xf32>
    %36 = vector.extract_strided_slice %35 {offsets = [0, 0], sizes = [8, 128], strides = [1, 1]} : vector<8x512xf32> to vector<8x128xf32>
    %37 = vector.extract_strided_slice %35 {offsets = [0, 128], sizes = [8, 128], strides = [1, 1]} : vector<8x512xf32> to vector<8x128xf32>
    %38 = arith.maximumf %36, %37 : vector<8x128xf32>
    %39 = vector.extract_strided_slice %35 {offsets = [0, 256], sizes = [8, 128], strides = [1, 1]} : vector<8x512xf32> to vector<8x128xf32>
    %40 = vector.extract_strided_slice %35 {offsets = [0, 384], sizes = [8, 128], strides = [1, 1]} : vector<8x512xf32> to vector<8x128xf32>
    %41 = arith.maximumf %39, %40 : vector<8x128xf32>
    %42 = arith.maximumf %38, %41 : vector<8x128xf32>
    %c0_23 = arith.constant 0 : index
    %c0_24 = arith.constant 0 : index
    %43 = vector.load %arg7[%c0_23, %c0_24] : memref<1x128xf32, #tpu.memory_space<vmem>>, vector<1x128xf32>
    %44 = vector.broadcast %43 : vector<1x128xf32> to vector<8x128xf32>
    %45 = arith.addf %42, %44 : vector<8x128xf32>
    %cst_25 = arith.constant 0.000000e+00 : f32
    %46 = vector.broadcast %cst_25 : f32 to vector<8x128xf32>
    %47 = arith.cmpf oge, %45, %46 : vector<8x128xf32>
    %cst_26 = arith.constant 5.000000e-02 : f32
    %48 = vector.broadcast %cst_26 : f32 to vector<8x128xf32>
    %49 = arith.mulf %48, %45 : vector<8x128xf32>
    %50 = arith.select %47, %45, %49 : vector<8x128xi1>, vector<8x128xf32>
    %c0_27 = arith.constant 0 : index
    %c0_28 = arith.constant 0 : index
    %51 = vector.load %arg8[%c0_27, %c0_28] : memref<128x64xf32, #tpu.memory_space<vmem>>, vector<128x64xf32>
    %cst_29 = arith.constant dense<0.000000e+00> : vector<8x64xf32>
    %52 = tpu.matmul %50, %51, %cst_29 {dimension_numbers = #tpu.dot_dimension_numbers<[1], [0], [0], [1], [0, 0, 1, 1], [], []>} : vector<8x128xf32>, vector<128x64xf32>, vector<8x64xf32> -> vector<8x64xf32>
    %c0_30 = arith.constant 0 : index
    %c0_31 = arith.constant 0 : index
    %53 = vector.load %arg9[%c0_30, %c0_31] : memref<1x64xf32, #tpu.memory_space<vmem>>, vector<1x64xf32>
    %54 = vector.broadcast %53 : vector<1x64xf32> to vector<8x64xf32>
    %55 = arith.addf %52, %54 : vector<8x64xf32>
    %c0_32 = arith.constant 0 : index
    %c0_33 = arith.constant 0 : index
    %56 = vector.load %arg10[%c0_32, %c0_33] : memref<8x64xf32, #tpu.memory_space<vmem>>, vector<8x64xf32>
    tpu.vector_store %arg10[%c0_32, %c0_33], %55 {strides = array<i32>} : memref<8x64xf32, #tpu.memory_space<vmem>>, vector<8x64xf32>,
    return
  }
  func.func @transform_0(%arg0: i32) -> (i32, i32) {
    %c0_i32 = arith.constant 0 : i32
    %c0_i32_0 = arith.constant 0 : i32
    return %arg0, %c0_i32 : i32, i32
  }
  func.func @transform_1(%arg0: i32) -> (i32, i32) {
    %c0_i32 = arith.constant 0 : i32
    %c0_i32_0 = arith.constant 0 : i32
    %c0_i32_1 = arith.constant 0 : i32
    return %c0_i32, %c0_i32_0 : i32, i32
  }
  func.func @transform_2(%arg0: i32) -> (i32, i32) {
    %c0_i32 = arith.constant 0 : i32
    %c0_i32_0 = arith.constant 0 : i32
    %c0_i32_1 = arith.constant 0 : i32
    return %c0_i32, %c0_i32_0 : i32, i32
  }
  func.func @transform_3(%arg0: i32) -> (i32, i32) {
    %c0_i32 = arith.constant 0 : i32
    %c0_i32_0 = arith.constant 0 : i32
    %c0_i32_1 = arith.constant 0 : i32
    return %c0_i32, %c0_i32_0 : i32, i32
  }
  func.func @transform_4(%arg0: i32) -> (i32, i32) {
    %c0_i32 = arith.constant 0 : i32
    %c0_i32_0 = arith.constant 0 : i32
    %c0_i32_1 = arith.constant 0 : i32
    return %c0_i32, %c0_i32_0 : i32, i32
  }
  func.func @transform_5(%arg0: i32) -> (i32, i32) {
    %c0_i32 = arith.constant 0 : i32
    %c0_i32_0 = arith.constant 0 : i32
    %c0_i32_1 = arith.constant 0 : i32
    return %c0_i32, %c0_i32_0 : i32, i32
  }
  func.func @transform_6(%arg0: i32) -> (i32, i32) {
    %c0_i32 = arith.constant 0 : i32
    %c0_i32_0 = arith.constant 0 : i32
    %c0_i32_1 = arith.constant 0 : i32
    return %c0_i32, %c0_i32_0 : i32, i32
  }
  func.func @transform_7(%arg0: i32) -> (i32, i32) {
    %c0_i32 = arith.constant 0 : i32
    %c0_i32_0 = arith.constant 0 : i32
    %c0_i32_1 = arith.constant 0 : i32
    return %c0_i32, %c0_i32_0 : i32, i32
  }
  func.func @transform_8(%arg0: i32) -> (i32, i32) {
    %c0_i32 = arith.constant 0 : i32
    %c0_i32_0 = arith.constant 0 : i32
    %c0_i32_1 = arith.constant 0 : i32
    return %c0_i32, %c0_i32_0 : i32, i32
  }
  func.func @transform_9(%arg0: i32) -> (i32, i32) {
    %c0_i32 = arith.constant 0 : i32
    %c0_i32_0 = arith.constant 0 : i32
    return %arg0, %c0_i32 : i32, i32
  }
}

</mosaic_0001>

<bundles_post_ra>
// kernel: squeeze.0
= control target key start
LH: loop header
LB: loop body
LE: loop exit
PB: predicated region body
PF: predicated region fallthrough
CT: control target
= control target key end

     0   :  { %s89_s8 = smov 112   ;;  %s90_s11 = smov 80   ;;  %vm3_vm0 = vcmask 130048   ;;  %vm9_vm1 = vcmask 1048448   ;;  %vm15_vm2 = vcmask 917248   ;;  %vm21_vm3 = vcmask 786048   ;;  %s142_s0 = inlined_call_operand.vmem [shape: f32[2,1,16,16], index: 0, kind: input, shape index: {}]   ;;  %s143_s1 = inlined_call_operand.vmem [shape: f32[2,1,256], index: 1, kind: output, shape index: {}]  }
   0x1   :  { %v72_v0 = vld [vmem:[%s142_s0 + $0x7] ss:$8 sm:$0xf]   ;;  %v74_v1 = vld [vmem:[%s142_s0 + $0x5] ss:$8 sm:$0xf]  }
   0x2   :  { %7 = vrot.lane.b32.xlu0 %v72_v0, %s89_s8  ;;  %19 = vrot.lane.b32.xlu1 %v74_v1, %s90_s11  ;;  %v73_v2 = vld [vmem:[%s142_s0 + $0x6] ss:$8 sm:$0xf]   ;;  %v75_v3 = vld [vmem:[%s142_s0 + $0x4] ss:$8 sm:$0xf]  }
   0x3   :  { %s91_s16 = smov 96   ;;  %v2_v4 = vld [vmem:[%s142_s0] ss:$8 sm:$0xf]   ;;  %s92_s19 = smov 64   ;;  %vm27_vm4 = vcmask 654848  }
   0x4   :  { %v76_v5 = vld [vmem:[%s142_s0 + $0x3] ss:$8 sm:$0xf]   ;;  %4 = vst.msk [vmem:[#allocation0] ss:$8 sm:$0xf] %vm3_vm0, %v2_v4  }
   0x5   :  { %v77_v6 = vld [vmem:[%s142_s0 + $0x2] ss:$8 sm:$0xf]   ;;  %s93_s24 = smov 48   ;;  %s94_s25 = smov 32   ;;  %vm33_vm5 = vcmask 523648  }
   0x6   :  { %13 = vrot.lane.b32.xlu0 %v73_v2, %s91_s16  ;;  %25 = vrot.lane.b32.xlu1 %v75_v3, %s92_s19  ;;  %v78_v7 = vld [vmem:[%s142_s0 + $0x1] ss:$8 sm:$0xf]   ;;  %s95_s0 = smov 16   ;;  %vm39_vm6 = vcmask 392448   ;;  %vm45_vm7 = vcmask 261248  }
   0xa   :  { %31 = vrot.lane.b32.xlu0 %v76_v5, %s93_s24  ;;  %37 = vrot.lane.b32.xlu1 %v77_v6, %s94_s25 }
   0xe   :  { %43 = vrot.lane.b32.xlu0 %v78_v7, %s95_s0 }
  0x74   :  { %v8_v8 = vpop.permute.xlu0 %7   ;;  %v20_v9 = vpop.permute.xlu1 %19  }
  0x75   :  { %10 = vst.msk [vmem:[#allocation0] ss:$8 sm:$0xf] %vm9_vm1, %v8_v8  }
  0x78   :  { %v14_v10 = vpop.permute.xlu0 %13   ;;  %v26_v11 = vpop.permute.xlu1 %25  }
  0x79   :  { %16 = vst.msk [vmem:[#allocation0] ss:$8 sm:$0xf] %vm15_vm2, %v14_v10  }
  0x7a   :  { %22 = vst.msk [vmem:[#allocation0] ss:$8 sm:$0xf] %vm21_vm3, %v20_v9  }
  0x7b   :  { %28 = vst.msk [vmem:[#allocation0] ss:$8 sm:$0xf] %vm27_vm4, %v26_v11  }
  0x7c   :  { %v32_v12 = vpop.permute.xlu0 %31   ;;  %v38_v13 = vpop.permute.xlu1 %37  }
  0x7d   :  { %34 = vst.msk [vmem:[#allocation0] ss:$8 sm:$0xf] %vm33_vm5, %v32_v12  }
  0x7e   :  { %40 = vst.msk [vmem:[#allocation0] ss:$8 sm:$0xf] %vm39_vm6, %v38_v13  }
  0x80   :  { %v44_v14 = vpop.permute.xlu0 %43  }
  0x81   :  { %46 = vst.msk [vmem:[#allocation0] ss:$8 sm:$0xf] %vm45_vm7, %v44_v14  }
  0x88   :  { %v50_v15 = vld [vmem:[#allocation0] sm:$0x1]  ;;  %v54_v16 = vld [vmem:[#allocation0 + $0x8] sm:$0x1]  ;;  %v59_v17 = vld [vmem:[#allocation0 + $0x10] sm:$0x1] }
  0x89   :  { %52 = vst [vmem:[%s143_s1] sm:$0x1] %v50_v15  ;;  %79 = vst [vmem:[%s143_s1 + $0x1] sm:$0x1] %v54_v16  ;;  %v65_v18 = vld [vmem:[#allocation0 + $0x18] sm:$0x1] }
  0x8a   :  { %80 = vst [vmem:[%s143_s1 + $0x2] sm:$0x1] %v59_v17  ;;  %81 = vst [vmem:[%s143_s1 + $0x3] sm:$0x1] %v65_v18 }

// kernel: forward.1
= control target key start
LH: loop header
LB: loop body
LE: loop exit
PB: predicated region body
PF: predicated region fallthrough
CT: control target
= control target key end

     0   :  { %v1726_v3 = vmov 0   ;;  %vm1728_vm10 = vmmov 0   ;;  %vm1182_vm12 = vcmask 523264   ;;  %s3251_s0 = inlined_call_operand.vmem [shape: f32[256,256], index: 0, kind: input, shape index: {}]   ;;  %s3252_s1 = inlined_call_operand.vmem [shape: f32[32,256], index: 1, kind: input, shape index: {}]   ;;  %s3253_s2 = inlined_call_operand.vmem [shape: f32[32,1], index: 2, kind: input, shape index: {}]   ;;  %s3254_s3 = inlined_call_operand.vmem [shape: f32[1024,256], index: 3, kind: input, shape index: {}]   ;;  %s3255_s5 = inlined_call_operand.vmem [shape: f32[256,512], index: 5, kind: input, shape index: {}]   ;;  %s3256_s4 = inlined_call_operand.vmem [shape: f32[1,256], index: 4, kind: input, shape index: {}]   ;;  %s3257_s7 = inlined_call_operand.vmem [shape: f32[128,64], index: 7, kind: input, shape index: {}]   ;;  %s3258_s6 = inlined_call_operand.vmem [shape: f32[1,128], index: 6, kind: input, shape index: {}]   ;;  %s3259_s8 = inlined_call_operand.vmem [shape: f32[1,64], index: 8, kind: input, shape index: {}]   ;;  %s3260_s9 = inlined_call_operand.vmem [shape: f32[8,64], index: 9, kind: output, shape index: {}]  }
   0x1   :  { %v41_v0 = vld [vmem:[%s3251_s0 + $0x8] sm:$0xff]  ;;  %v43_v1 = vld [vmem:[%s3251_s0 + $0x18] sm:$0xff]  ;;  %v40_v2 = vld [vmem:[%s3251_s0] sm:$0xff]  ;;  %1724 = vset.pattern.permute.xlu0 %v1726_v3  ;;  %1725 = vset.pattern.permute.xlu1 %v1726_v3 }
   0x2   :  { %v1242_v4 = vpack.c.bf16 %v43_v1, %v41_v0  ;;  %v42_v5 = vld [vmem:[%s3251_s0 + $0x10] sm:$0xff]  ;;  %v45_v6 = vld [vmem:[%s3251_s0 + $0x28] sm:$0xff]  ;;  %v47_v7 = vld [vmem:[%s3251_s0 + $0x38] sm:$0xff] }
   0x3   :  { %v1244_v8 = vpack.c.bf16 %v42_v5, %v40_v2  ;;  %v1246_v9 = vpack.c.bf16 %v47_v7, %v45_v6  ;;  %v44_v10 = vld [vmem:[%s3251_s0 + $0x20] sm:$0xff]  ;;  %v46_v11 = vld [vmem:[%s3251_s0 + $0x30] sm:$0xff]  ;;  %v49_v12 = vld [vmem:[%s3251_s0 + $0x48] sm:$0xff] }
   0x4   :  { %1243 = vmatprep.subr.bf16.mxu0 %v1242_v4  ;;  %v51_v13 = vld [vmem:[%s3251_s0 + $0x58] sm:$0xff]  ;;  %v1248_v14 = vpack.c.bf16 %v46_v11, %v44_v10  ;;  %v48_v16 = vld [vmem:[%s3251_s0 + $0x40] sm:$0xff]  ;;  %v50_v17 = vld [vmem:[%s3251_s0 + $0x50] sm:$0xff] }
   0x5   :  { %1245 = vmatpush1.bf16.msra.mxu0 %v1244_v8  ;;  %v1250_v15 = vpack.c.bf16 %v51_v13, %v49_v12  ;;  %v53_v18 = vld [vmem:[%s3251_s0 + $0x68] sm:$0xff]  ;;  %v55_v19 = vld [vmem:[%s3251_s0 + $0x78] sm:$0xff]  ;;  %v1252_v20 = vpack.c.bf16 %v50_v17, %v48_v16  ;;  %v52_v22 = vld [vmem:[%s3251_s0 + $0x60] sm:$0xff] }
   0x6   :  { %1247 = vmatprep.subr.bf16.mxu0 %v1246_v9  ;;  %v1254_v21 = vpack.c.bf16 %v55_v19, %v53_v18  ;;  %v54_v23 = vld [vmem:[%s3251_s0 + $0x70] sm:$0xff]  ;;  %v57_v24 = vld [vmem:[%s3251_s0 + $0x88] sm:$0xff]  ;;  %v59_v25 = vld [vmem:[%s3251_s0 + $0x98] sm:$0xff] }
   0x7   :  { %v1256_v26 = vpack.c.bf16 %v54_v23, %v52_v22  ;;  %v1258_v27 = vpack.c.bf16 %v59_v25, %v57_v24  ;;  %v56_v28 = vld [vmem:[%s3251_s0 + $0x80] sm:$0xff]  ;;  %v58_v29 = vld [vmem:[%s3251_s0 + $0x90] sm:$0xff]  ;;  %v61_v30 = vld [vmem:[%s3251_s0 + $0xa8] sm:$0xff] }
   0x8   :  { %v63_v31 = vld [vmem:[%s3251_s0 + $0xb8] sm:$0xff]  ;;  %v1260_v32 = vpack.c.bf16 %v58_v29, %v56_v28  ;;  %v60_v34 = vld [vmem:[%s3251_s0 + $0xa0] sm:$0xff]  ;;  %v62_v35 = vld [vmem:[%s3251_s0 + $0xb0] sm:$0xff] }
   0x9   :  { %1249 = vmatpush1.bf16.msra.mxu0 %v1248_v14  ;;  %v1262_v33 = vpack.c.bf16 %v63_v31, %v61_v30  ;;  %v65_v36 = vld [vmem:[%s3251_s0 + $0xc8] sm:$0xff]  ;;  %v67_v37 = vld [vmem:[%s3251_s0 + $0xd8] sm:$0xff]  ;;  %v1264_v38 = vpack.c.bf16 %v62_v35, %v60_v34  ;;  %v64_v40 = vld [vmem:[%s3251_s0 + $0xc0] sm:$0xff] }
   0xa   :  { %1251 = vmatprep.subr.bf16.mxu0 %v1250_v15  ;;  %v1266_v39 = vpack.c.bf16 %v67_v37, %v65_v36  ;;  %v66_v41 = vld [vmem:[%s3251_s0 + $0xd0] sm:$0xff]  ;;  %v33_v42 = vld [vmem:[%s3252_s1 + $0x8] sm:$0xff]  ;;  %v71_v44 = vld [vmem:[%s3251_s0 + $0xf8] sm:$0xff] }
   0xb   :  { %v69_v43 = vld [vmem:[%s3251_s0 + $0xe8] sm:$0xff]  ;;  %192 = vmatprep.mubr.f32.mxu0 %v33_v42  ;;  %v68_v46 = vld [vmem:[%s3251_s0 + $0xe0] sm:$0xff]  ;;  %v70_v47 = vld [vmem:[%s3251_s0 + $0xf0] sm:$0xff]  ;;  %v1268_v48 = vpack.c.bf16 %v66_v41, %v64_v40 }
   0xc   :  { %v105_v45 = vld [vmem:[%s3253_s2 + $0x8] sm:$0xff]  ;;  %v75_v50 = vld [vmem:[%s3251_s0 + $0x118] sm:$0xff]  ;;  %v104_v51 = vld [vmem:[%s3253_s2] sm:$0xff]  ;;  %v1270_v53 = vpack.c.bf16 %v71_v44, %v69_v43  ;;  %v1272_v2 = vpack.c.bf16 %v70_v47, %v68_v46 }
   0xd   :  { %1253 = vmatpush1.bf16.msra.mxu0 %v1252_v20  ;;  %115 = vperm.xlu0 %1724, %v105_v45   ;;  %v73_v49 = vld [vmem:[%s3251_s0 + $0x108] sm:$0xff]  ;;  %v308_v54 = vld [vmem:[%s3254_s3 + $0x218] sm:$0xff]  ;;  %v305_v55 = vld [vmem:[%s3254_s3 + $0x200] sm:$0xff] }
   0xe   :  { %1255 = vmatprep.subr.bf16.mxu0 %v1254_v21  ;;  %v306_v52 = vld [vmem:[%s3254_s3 + $0x208] sm:$0xff]  ;;  %v307_v56 = vld [vmem:[%s3254_s3 + $0x210] sm:$0xff]  ;;  %v312_v60 = vld [vmem:[%s3254_s3 + $0x238] sm:$0xff]  ;;  %v1274_v3 = vpack.c.bf16 %v75_v50, %v73_v49 }
   0xf   :  { %v1306_v57 = vpack.c.bf16 %v308_v54, %v306_v52  ;;  %v1308_v58 = vpack.c.bf16 %v307_v56, %v305_v55  ;;  %v310_v59 = vld [vmem:[%s3254_s3 + $0x228] sm:$0xff]  ;;  %v309_v61 = vld [vmem:[%s3254_s3 + $0x220] sm:$0xff]  ;;  %v311_v63 = vld [vmem:[%s3254_s3 + $0x230] sm:$0xff] }
  0x10   :  { %v1310_v62 = vpack.c.bf16 %v312_v60, %v310_v59  ;;  %v314_v0 = vld [vmem:[%s3254_s3 + $0x248] sm:$0xff]  ;;  %v316_v1 = vld [vmem:[%s3254_s3 + $0x258] sm:$0xff]  ;;  %v72_v4 = vld [vmem:[%s3251_s0 + $0x100] sm:$0xff]  ;;  %v1312_v7 = vpack.c.bf16 %v311_v63, %v309_v61 }
  0x11   :  { %1257 = vmatpush1.bf16.msra.mxu0 %v1256_v26  ;;  %110 = vperm.xlu0 %1724, %v104_v51   ;;  %v74_v5 = vld [vmem:[%s3251_s0 + $0x110] sm:$0xff]  ;;  %v77_v6 = vld [vmem:[%s3251_s0 + $0x128] sm:$0xff]  ;;  %v79_v8 = vld [vmem:[%s3251_s0 + $0x138] sm:$0xff]  ;;  %v1314_v9 = vpack.c.bf16 %v316_v1, %v314_v0 }
  0x12   :  { %1259 = vmatprep.subr.bf16.mxu0 %v1258_v27  ;;  %1307 = vmatprep.subr.bf16.mxu1 %v1306_v57  ;;  %v313_v10 = vld [vmem:[%s3254_s3 + $0x240] sm:$0xff]  ;;  %v315_v11 = vld [vmem:[%s3254_s3 + $0x250] sm:$0xff]  ;;  %v318_v12 = vld [vmem:[%s3254_s3 + $0x268] sm:$0xff]  ;;  %v1276_v14 = vpack.c.bf16 %v74_v5, %v72_v4  ;;  %v1278_v15 = vpack.c.bf16 %v79_v8, %v77_v6 }
  0x13   :  { %1309 = vmatpush1.bf16.msra.mxu1 %v1308_v58  ;;  %v320_v13 = vld [vmem:[%s3254_s3 + $0x278] sm:$0xff]  ;;  %v76_v16 = vld [vmem:[%s3251_s0 + $0x120] sm:$0xff]  ;;  %v78_v17 = vld [vmem:[%s3251_s0 + $0x130] sm:$0xff]  ;;  %v1316_v19 = vpack.c.bf16 %v315_v11, %v313_v10 }
  0x14   :  { %1311 = vmatprep.subr.bf16.mxu1 %v1310_v62  ;;  %v81_v18 = vld [vmem:[%s3251_s0 + $0x148] sm:$0xff]  ;;  %v83_v20 = vld [vmem:[%s3251_s0 + $0x158] sm:$0xff]  ;;  %v1318_v21 = vpack.c.bf16 %v320_v13, %v318_v12  ;;  %v317_v22 = vld [vmem:[%s3254_s3 + $0x260] sm:$0xff]  ;;  %v1280_v26 = vpack.c.bf16 %v78_v17, %v76_v16 }
  0x15   :  { %1261 = vmatpush1.bf16.msra.mxu0 %v1260_v32  ;;  %v319_v23 = vld [vmem:[%s3254_s3 + $0x270] sm:$0xff]  ;;  %v322_v24 = vld [vmem:[%s3254_s3 + $0x288] sm:$0xff]  ;;  %v324_v25 = vld [vmem:[%s3254_s3 + $0x298] sm:$0xff]  ;;  %v1282_v27 = vpack.c.bf16 %v83_v20, %v81_v18 }
  0x16   :  { %1263 = vmatprep.subr.bf16.mxu0 %v1262_v33  ;;  %v80_v28 = vld [vmem:[%s3251_s0 + $0x140] sm:$0xff]  ;;  %v82_v29 = vld [vmem:[%s3251_s0 + $0x150] sm:$0xff]  ;;  %v85_v30 = vld [vmem:[%s3251_s0 + $0x168] sm:$0xff]  ;;  %v1320_v31 = vpack.c.bf16 %v319_v23, %v317_v22  ;;  %v1322_v33 = vpack.c.bf16 %v324_v25, %v322_v24 }
  0x17   :  { %1313 = vmatpush1.bf16.msra.mxu1 %v1312_v7  ;;  %v87_v32 = vld [vmem:[%s3251_s0 + $0x178] sm:$0xff]  ;;  %v321_v34 = vld [vmem:[%s3254_s3 + $0x280] sm:$0xff]  ;;  %v323_v35 = vld [vmem:[%s3254_s3 + $0x290] sm:$0xff] }
  0x18   :  { %1315 = vmatprep.subr.bf16.mxu1 %v1314_v9  ;;  %v326_v36 = vld [vmem:[%s3254_s3 + $0x2a8] sm:$0xff]  ;;  %v328_v37 = vld [vmem:[%s3254_s3 + $0x2b8] sm:$0xff]  ;;  %v84_v40 = vld [vmem:[%s3251_s0 + $0x160] sm:$0xff]  ;;  %v1324_v43 = vpack.c.bf16 %v323_v35, %v321_v34 }
  0x19   :  { %1265 = vmatpush1.bf16.msra.mxu0 %v1264_v38  ;;  %v1284_v38 = vpack.c.bf16 %v82_v29, %v80_v28  ;;  %v86_v41 = vld [vmem:[%s3251_s0 + $0x170] sm:$0xff]  ;;  %v89_v42 = vld [vmem:[%s3251_s0 + $0x188] sm:$0xff]  ;;  %v91_v44 = vld [vmem:[%s3251_s0 + $0x198] sm:$0xff]  ;;  %v1326_v45 = vpack.c.bf16 %v328_v37, %v326_v36 }
  0x1a   :  { %1267 = vmatprep.subr.bf16.mxu0 %v1266_v39  ;;  %v1286_v39 = vpack.c.bf16 %v87_v32, %v85_v30  ;;  %v325_v46 = vld [vmem:[%s3254_s3 + $0x2a0] sm:$0xff]  ;;  %v327_v47 = vld [vmem:[%s3254_s3 + $0x2b0] sm:$0xff]  ;;  %v332_v49 = vld [vmem:[%s3254_s3 + $0x2d8] sm:$0xff]  ;;  %v1288_v51 = vpack.c.bf16 %v86_v41, %v84_v40  ;;  %v1290_v52 = vpack.c.bf16 %v91_v44, %v89_v42 }
  0x1b   :  { %1317 = vmatpush1.bf16.msra.mxu1 %v1316_v19  ;;  %v106_v50 = vld [vmem:[%s3253_s2 + $0x10] sm:$0xff]  ;;  %v93_v55 = vld [vmem:[%s3251_s0 + $0x1a8] sm:$0xff]  ;;  %v1328_v56 = vpack.c.bf16 %v327_v47, %v325_v46  ;;  %v95_v57 = vld [vmem:[%s3251_s0 + $0x1b8] sm:$0xff] }
  0x1c   :  { %1319 = vmatprep.subr.bf16.mxu1 %v1318_v21  ;;  %120 = vperm.xlu1 %1725, %v106_v50   ;;  %v90_v54 = vld [vmem:[%s3251_s0 + $0x190] sm:$0xff]  ;;  %v329_v59 = vld [vmem:[%s3254_s3 + $0x2c0] sm:$0xff]  ;;  %v334_v61 = vld [vmem:[%s3254_s3 + $0x2e8] sm:$0xff]  ;;  %v1294_v0 = vpack.c.bf16 %v95_v57, %v93_v55 }
  0x1d   :  { %1269 = vmatpush1.bf16.msra.mxu0 %v1268_v48  ;;  %v330_v48 = vld [vmem:[%s3254_s3 + $0x2c8] sm:$0xff]  ;;  %v331_v60 = vld [vmem:[%s3254_s3 + $0x2d0] sm:$0xff]  ;;  %v336_v62 = vld [vmem:[%s3254_s3 + $0x2f8] sm:$0xff] }
  0x1e   :  { %1271 = vmatprep.subr.bf16.mxu0 %v1270_v53  ;;  %v88_v53 = vld [vmem:[%s3251_s0 + $0x180] sm:$0xff]  ;;  %v1330_v58 = vpack.c.bf16 %v332_v49, %v330_v48  ;;  %v1332_v4 = vpack.c.bf16 %v331_v60, %v329_v59  ;;  %v99_v5 = vld [vmem:[%s3251_s0 + $0x1d8] sm:$0xff]  ;;  %v1334_v6 = vpack.c.bf16 %v336_v62, %v334_v61  ;;  %v335_v8 = vld [vmem:[%s3254_s3 + $0x2f0] sm:$0xff] }
  0x1f   :  { %1321 = vmatpush1.bf16.msra.mxu1 %v1320_v31  ;;  %v1292_v63 = vpack.c.bf16 %v90_v54, %v88_v53  ;;  %v92_v1 = vld [vmem:[%s3251_s0 + $0x1a0] sm:$0xff]  ;;  %v338_v9 = vld [vmem:[%s3254_s3 + $0x308] sm:$0xff]  ;;  %v340_v10 = vld [vmem:[%s3254_s3 + $0x318] sm:$0xff] }
  0x20   :  { %1323 = vmatprep.subr.bf16.mxu1 %v1322_v33  ;;  %v333_v7 = vld [vmem:[%s3254_s3 + $0x2e0] sm:$0xff]  ;;  %v103_v17 = vld [vmem:[%s3251_s0 + $0x1f8] sm:$0xff]  ;;  %v1338_v18 = vpack.c.bf16 %v340_v10, %v338_v9  ;;  %v339_v20 = vld [vmem:[%s3254_s3 + $0x310] sm:$0xff] }
  0x21   :  { %1273 = vmatpush1.bf16.msra.mxu0 %v1272_v2  ;;  %v94_v2 = vld [vmem:[%s3251_s0 + $0x1b0] sm:$0xff]  ;;  %v96_v13 = vld [vmem:[%s3251_s0 + $0x1c0] sm:$0xff]  ;;  %v1336_v16 = vpack.c.bf16 %v335_v8, %v333_v7  ;;  %v342_v21 = vld [vmem:[%s3254_s3 + $0x328] sm:$0xff] }
  0x22   :  { %1275 = vmatprep.subr.bf16.mxu0 %v1274_v3  ;;  %v97_v3 = vld [vmem:[%s3251_s0 + $0x1c8] sm:$0xff]  ;;  %v1296_v11 = vpack.c.bf16 %v94_v2, %v92_v1  ;;  %v337_v19 = vld [vmem:[%s3254_s3 + $0x300] sm:$0xff]  ;;  %v344_v22 = vld [vmem:[%s3254_s3 + $0x338] sm:$0xff] }
  0x23   :  { %1325 = vmatpush1.bf16.msra.mxu1 %v1324_v43  ;;  %v1298_v12 = vpack.c.bf16 %v99_v5, %v97_v3  ;;  %v100_v25 = vld [vmem:[%s3251_s0 + $0x1e0] sm:$0xff]  ;;  %v1342_v28 = vpack.c.bf16 %v344_v22, %v342_v21  ;;  %v343_v30 = vld [vmem:[%s3254_s3 + $0x330] sm:$0xff]  ;;  %v346_v31 = vld [vmem:[%s3254_s3 + $0x348] sm:$0xff] }
  0x24   :  { %1327 = vmatprep.subr.bf16.mxu1 %v1326_v45  ;;  %v341_v29 = vld [vmem:[%s3254_s3 + $0x320] sm:$0xff]  ;;  %v348_v32 = vld [vmem:[%s3254_s3 + $0x358] sm:$0xff]  ;;  %v347_v37 = vld [vmem:[%s3254_s3 + $0x350] sm:$0xff] }
  0x25   :  { %1277 = vmatpush1.bf16.msra.mxu0 %v1276_v14  ;;  %v98_v14 = vld [vmem:[%s3251_s0 + $0x1d0] sm:$0xff]  ;;  %v1344_v34 = vpack.c.bf16 %v343_v30, %v341_v29  ;;  %v1346_v35 = vpack.c.bf16 %v348_v32, %v346_v31  ;;  %v345_v36 = vld [vmem:[%s3254_s3 + $0x340] sm:$0xff]  ;;  %v35_v41 = vld [vmem:[%s3252_s1 + $0x18] sm:$0xff] }
  0x26   :  { %1279 = vmatprep.subr.bf16.mxu0 %v1278_v15  ;;  %v101_v15 = vld [vmem:[%s3251_s0 + $0x1e8] sm:$0xff]  ;;  %v1300_v23 = vpack.c.bf16 %v98_v14, %v96_v13  ;;  %v32_v40 = vld [vmem:[%s3252_s1] sm:$0xff]  ;;  %v1348_v42 = vpack.c.bf16 %v347_v37, %v345_v36  ;;  %v351_v45 = vld [vmem:[%s3254_s3 + $0x370] sm:$0xff] }
  0x27   :  { %1329 = vmatpush1.bf16.msra.mxu1 %v1328_v56  ;;  %v1302_v24 = vpack.c.bf16 %v103_v17, %v101_v15  ;;  %v349_v44 = vld [vmem:[%s3254_s3 + $0x360] sm:$0xff]  ;;  %v354_v46 = vld [vmem:[%s3254_s3 + $0x388] sm:$0xff]  ;;  %v356_v47 = vld [vmem:[%s3254_s3 + $0x398] sm:$0xff] }
  0x28   :  { %1331 = vmatprep.subr.bf16.mxu1 %v1330_v58  ;;  %v34_v48 = vld [vmem:[%s3252_s1 + $0x10] sm:$0xff]  ;;  %v37_v49 = vld [vmem:[%s3252_s1 + $0x28] sm:$0xff]  ;;  %v1352_v50 = vpack.c.bf16 %v351_v45, %v349_v44  ;;  %v360_v55 = vld [vmem:[%s3254_s3 + $0x3b8] sm:$0xff] }
  0x29   :  { %1281 = vmatpush1.bf16.msra.mxu0 %v1280_v26  ;;  %v102_v26 = vld [vmem:[%s3251_s0 + $0x1f0] sm:$0xff]  ;;  %v358_v54 = vld [vmem:[%s3254_s3 + $0x3a8] sm:$0xff]  ;;  %v36_v56 = vld [vmem:[%s3252_s1 + $0x20] sm:$0xff] }
  0x2a   :  { %1283 = vmatprep.subr.bf16.mxu0 %v1282_v27  ;;  %v1340_v27 = vpack.c.bf16 %v339_v20, %v337_v19  ;;  %v1304_v33 = vpack.c.bf16 %v102_v26, %v100_v25  ;;  %v355_v53 = vld [vmem:[%s3254_s3 + $0x390] sm:$0xff]  ;;  %v39_v57 = vld [vmem:[%s3252_s1 + $0x38] sm:$0xff]  ;;  %v1358_v59 = vpack.c.bf16 %v360_v55, %v358_v54  ;;  %v357_v60 = vld [vmem:[%s3254_s3 + $0x3a0] sm:$0xff] }
  0x2b   :  { %1333 = vmatpush1.bf16.msra.mxu1 %v1332_v4  ;;  %v359_v61 = vld [vmem:[%s3254_s3 + $0x3b0] sm:$0xff]  ;;  %v364_v1 = vld [vmem:[%s3254_s3 + $0x3d8] sm:$0xff]  ;;  %v361_v3 = vld [vmem:[%s3254_s3 + $0x3c0] sm:$0xff] }
  0x2c   :  { %1335 = vmatprep.subr.bf16.mxu1 %v1334_v6  ;;  %v38_v62 = vld [vmem:[%s3252_s1 + $0x30] sm:$0xff]  ;;  %v107_v6 = vld [vmem:[%s3253_s2 + $0x18] sm:$0xff]  ;;  %v366_v7 = vld [vmem:[%s3254_s3 + $0x3e8] sm:$0xff] }
  0x2d   :  { %1285 = vmatpush1.bf16.msra.mxu0 %v1284_v38  ;;  %v350_v38 = vld [vmem:[%s3254_s3 + $0x368] sm:$0xff]  ;;  %v363_v4 = vld [vmem:[%s3254_s3 + $0x3d0] sm:$0xff]  ;;  %125 = vperm.xlu1 %1725, %v107_v6   ;;  %v368_v8 = vld [vmem:[%s3254_s3 + $0x3f8] sm:$0xff] }
  0x2e   :  { %1287 = vmatprep.subr.bf16.mxu0 %v1286_v39  ;;  %v352_v39 = vld [vmem:[%s3254_s3 + $0x378] sm:$0xff]  ;;  %v1364_v5 = vpack.c.bf16 %v363_v4, %v361_v3  ;;  %v1366_v9 = vpack.c.bf16 %v368_v8, %v366_v7  ;;  %v365_v10 = vld [vmem:[%s3254_s3 + $0x3e0] sm:$0xff]  ;;  %v242_v13 = vld [vmem:[%s3254_s3 + $0x8] sm:$0xff] }
  0x2f   :  { %1337 = vmatpush1.bf16.msra.mxu1 %v1336_v16  ;;  %v1350_v43 = vpack.c.bf16 %v352_v39, %v350_v38  ;;  %v244_v14 = vld [vmem:[%s3254_s3 + $0x18] sm:$0xff]  ;;  %v241_v25 = vld [vmem:[%s3254_s3] sm:$0xff]  ;;  %v243_v26 = vld [vmem:[%s3254_s3 + $0x10] sm:$0xff] }
  0x30   :  { %1339 = vmatprep.subr.bf16.mxu1 %v1338_v18  ;;  %v1370_v15 = vpack.c.bf16 %v244_v14, %v242_v13  ;;  %v246_v29 = vld [vmem:[%s3254_s3 + $0x28] sm:$0xff]  ;;  %v248_v30 = vld [vmem:[%s3254_s3 + $0x38] sm:$0xff]  ;;  %v245_v37 = vld [vmem:[%s3254_s3 + $0x20] sm:$0xff] }
  0x31   :  { %1289 = vmatpush1.bf16.msra.mxu0 %v1288_v51  ;;  %v1354_v51 = vpack.c.bf16 %v356_v47, %v354_v46  ;;  %v1374_v36 = vpack.c.bf16 %v248_v30, %v246_v29  ;;  %v247_v38 = vld [vmem:[%s3254_s3 + $0x30] sm:$0xff]  ;;  %v249_v47 = vld [vmem:[%s3254_s3 + $0x40] sm:$0xff]  ;;  %v258_v55 = vld [vmem:[%s3254_s3 + $0x88] sm:$0xff] }
  0x32   :  { %1291 = vmatprep.subr.bf16.mxu0 %v1290_v52  ;;  %v353_v52 = vld [vmem:[%s3254_s3 + $0x380] sm:$0xff]  ;;  %v1376_v44 = vpack.c.bf16 %v247_v38, %v245_v37  ;;  %v255_v54 = vld [vmem:[%s3254_s3 + $0x70] sm:$0xff]  ;;  %v266_v3 = vld [vmem:[%s3254_s3 + $0xc8] sm:$0xff] }
  0x33   :  { %1341 = vmatpush1.bf16.msra.mxu1 %v1340_v27  ;;  %v1356_v58 = vpack.c.bf16 %v355_v53, %v353_v52  ;;  %v253_v53 = vld [vmem:[%s3254_s3 + $0x60] sm:$0xff]  ;;  %v268_v4 = vld [vmem:[%s3254_s3 + $0xd8] sm:$0xff]  ;;  %v267_v8 = vld [vmem:[%s3254_s3 + $0xd0] sm:$0xff] }
  0x34   :  { %1343 = vmatprep.subr.bf16.mxu1 %v1342_v28  ;;  %v1394_v6 = vpack.c.bf16 %v268_v4, %v266_v3  ;;  %v265_v7 = vld [vmem:[%s3254_s3 + $0xc0] sm:$0xff]  ;;  %v271_v14 = vld [vmem:[%s3254_s3 + $0xf0] sm:$0xff]  ;;  %v282_v29 = vld [vmem:[%s3254_s3 + $0x148] sm:$0xff] }
  0x35   :  { %1293 = vmatpush1.bf16.msra.mxu0 %v1292_v63  ;;  %v1360_v63 = vpack.c.bf16 %v359_v61, %v357_v60  ;;  %v259_v60 = vld [vmem:[%s3254_s3 + $0x90] sm:$0xff]  ;;  %v262_v61 = vld [vmem:[%s3254_s3 + $0xa8] sm:$0xff]  ;;  %v269_v13 = vld [vmem:[%s3254_s3 + $0xe0] sm:$0xff] }
  0x36   :  { %1295 = vmatprep.subr.bf16.mxu0 %v1294_v0  ;;  %v362_v0 = vld [vmem:[%s3254_s3 + $0x3c8] sm:$0xff]  ;;  %v284_v30 = vld [vmem:[%s3254_s3 + $0x158] sm:$0xff]  ;;  %v301_v4 = vld [vmem:[%s3254_s3 + $0x1e0] sm:$0xff] }
  0x37   :  { %1345 = vmatpush1.bf16.msra.mxu1 %v1344_v34  ;;  %v1362_v2 = vpack.c.bf16 %v364_v1, %v362_v0  ;;  %v261_v1 = vld [vmem:[%s3254_s3 + $0xa0] sm:$0xff]  ;;  %v286_v37 = vld [vmem:[%s3254_s3 + $0x168] sm:$0xff]  ;;  %v288_v38 = vld [vmem:[%s3254_s3 + $0x178] sm:$0xff] }
  0x38   :  { %1347 = vmatprep.subr.bf16.mxu1 %v1346_v35 }
  0x39   :  { %1297 = vmatpush1.bf16.msra.mxu0 %v1296_v11  ;;  %v367_v11 = vld [vmem:[%s3254_s3 + $0x3f0] sm:$0xff] }
  0x3a   :  { %1299 = vmatprep.subr.bf16.mxu0 %v1298_v12  ;;  %v1368_v12 = vpack.c.bf16 %v367_v11, %v365_v10  ;;  %v272_v10 = vld [vmem:[%s3254_s3 + $0xf8] sm:$0xff]  ;;  %v1396_v11 = vpack.c.bf16 %v267_v8, %v265_v7  ;;  %v512_v8 = vld [vmem:[%s3254_s3 + $0x408] sm:$0xff] }
  0x3b   :  { %1349 = vmatpush1.bf16.msra.mxu1 %v1348_v42 }
  0x3c   :  { %1351 = vmatprep.subr.bf16.mxu1 %v1350_v43 }
  0x3d   :  { %1301 = vmatpush1.bf16.msra.mxu0 %v1300_v23 }
  0x3e   :  { %1303 = vmatprep.subr.bf16.mxu0 %v1302_v24 }
  0x3f   :  { %1353 = vmatpush1.bf16.msra.mxu1 %v1352_v50  ;;  %v256_v50 = vld [vmem:[%s3254_s3 + $0x78] sm:$0xff] }
  0x40   :  { %1355 = vmatprep.subr.bf16.mxu1 %v1354_v51 }
  0x41   :  { %1305 = vmatpush1.bf16.msra.mxu0 %v1304_v33  ;;  %v1372_v33 = vpack.c.bf16 %v243_v26, %v241_v25 }
  0x43   :  { %1357 = vmatpush1.bf16.msra.mxu1 %v1356_v58 }
  0x44   :  { %193 = vmatmul.mubr.f32.vlgmr.msra.gmra.mrb[0].mxu0 %v32_v40  ;;  %1359 = vmatprep.subr.bf16.mxu1 %v1358_v59  ;;  %v250_v40 = vld [vmem:[%s3254_s3 + $0x48] sm:$0xff]  ;;  %v257_v59 = vld [vmem:[%s3254_s3 + $0x80] sm:$0xff] }
  0x45   :  { %198 = vmatprep.mubr.f32.mxu0 %v35_v41  ;;  %v252_v41 = vld [vmem:[%s3254_s3 + $0x58] sm:$0xff] }
  0x46   :  { %v1378_v46 = vpack.c.bf16 %v252_v41, %v250_v40  ;;  %v1414_v40 = vpack.c.bf16 %v288_v38, %v286_v37  ;;  %v285_v41 = vld [vmem:[%s3254_s3 + $0x160] sm:$0xff]  ;;  %v814_v38 = vld [vmem:[%s3255_s5 + $0x48] sm:$0xff] }
  0x47   :  { %1361 = vmatpush1.bf16.msra.mxu1 %v1360_v63  ;;  %v1388_v63 = vpack.c.bf16 %v259_v60, %v257_v59  ;;  %v809_v37 = vld [vmem:[%s3255_s5 + $0x20] sm:$0xff] }
  0x48   :  { %199 = vmatmul.mubr.f32.gmra.mrb[2].mxu0 %v34_v48  ;;  %1363 = vmatprep.subr.bf16.mxu1 %v1362_v2  ;;  %v251_v48 = vld [vmem:[%s3254_s3 + $0x50] sm:$0xff] }
  0x49   :  { %204 = vmatprep.mubr.f32.mxu0 %v37_v49  ;;  %v254_v49 = vld [vmem:[%s3254_s3 + $0x68] sm:$0xff]  ;;  %v1380_v51 = vpack.c.bf16 %v251_v48, %v249_v47  ;;  %v263_v2 = vld [vmem:[%s3254_s3 + $0xb0] sm:$0xff] }
  0x4a   :  { %v1382_v52 = vpack.c.bf16 %v256_v50, %v254_v49  ;;  %v289_v49 = vld [vmem:[%s3254_s3 + $0x180] sm:$0xff]  ;;  %v291_v50 = vld [vmem:[%s3254_s3 + $0x190] sm:$0xff] }
  0x4b   :  { %1365 = vmatpush1.bf16.msra.mxu1 %v1364_v5  ;;  %v1392_v5 = vpack.c.bf16 %v263_v2, %v261_v1 }
  0x4c   :  { %205 = vmatmul.mubr.f32.gmra.mrb[4].mxu0 %v36_v56  ;;  %1367 = vmatprep.subr.bf16.mxu1 %v1366_v9  ;;  %v260_v56 = vld [vmem:[%s3254_s3 + $0x98] sm:$0xff]  ;;  %v270_v9 = vld [vmem:[%s3254_s3 + $0xe8] sm:$0xff] }
  0x4d   :  { %210 = vmatprep.mubr.f32.mxu0 %v39_v57  ;;  %v1384_v57 = vpack.c.bf16 %v255_v54, %v253_v53  ;;  %v1386_v58 = vpack.c.bf16 %v260_v56, %v258_v55  ;;  %v1420_v53 = vpack.c.bf16 %v291_v50, %v289_v49  ;;  %v293_v55 = vld [vmem:[%s3254_s3 + $0x1a0] sm:$0xff]  ;;  %v295_v56 = vld [vmem:[%s3254_s3 + $0x1b0] sm:$0xff] }
  0x4e   :  { %v1424_v59 = vpack.c.bf16 %v295_v56, %v293_v55  ;;  %v523_v49 = vld [vmem:[%s3254_s3 + $0x460] sm:$0xff]  ;;  %v525_v50 = vld [vmem:[%s3254_s3 + $0x470] sm:$0xff] }
  0x4f   :  { %1369 = vmatpush1.bf16.msra.mxu1 %v1368_v12  ;;  %v1398_v12 = vpack.c.bf16 %v272_v10, %v270_v9  ;;  %v514_v9 = vld [vmem:[%s3254_s3 + $0x418] sm:$0xff]  ;;  %v821_v55 = vld [vmem:[%s3255_s5 + $0x80] sm:$0xff] }
  0x50   :  { %211 = vmatmul.mubr.f32.gmra.mrb[6].mxu0 %v38_v62  ;;  %1371 = vmatprep.subr.bf16.mxu1 %v1370_v15  ;;  %v264_v62 = vld [vmem:[%s3254_s3 + $0xb8] sm:$0xff]  ;;  %v274_v15 = vld [vmem:[%s3254_s3 + $0x108] sm:$0xff]  ;;  %v825_v56 = vld [vmem:[%s3255_s5 + $0xa0] sm:$0xff] }
  0x51   :  { %v1390_v0 = vpack.c.bf16 %v264_v62, %v262_v61  ;;  %v297_v61 = vld [vmem:[%s3254_s3 + $0x1c0] sm:$0xff]  ;;  %v299_v62 = vld [vmem:[%s3254_s3 + $0x1d0] sm:$0xff] }
  0x52   :  { %v1428_v1 = vpack.c.bf16 %v299_v62, %v297_v61  ;;  %v527_v61 = vld [vmem:[%s3254_s3 + $0x480] sm:$0xff]  ;;  %v529_v62 = vld [vmem:[%s3254_s3 + $0x490] sm:$0xff] }
  0x8c   :  { %v116_v16 = vpop.permute.xlu0 %115 }
  0x90   :  { %v2206_v17 = vpop.permute.xlu0 %110 }
  0x9b   :  { %v2399_v2 = vpop.permute.xlu1 %120 }
 0x117   :  { %v2208_v18 = vpop.f32.mrb[0].mxu0 }
 0x118   :  { %v196_v19 = vpop.f32.mrb[1].mxu0  ;;  %v195_v7 = vadd.f32 %v2208_v18, %v2206_v17 }
 0x119   :  { %v197_v20 = vadd.f32 %v196_v19, %v2206_v17  ;;  %v1400_v19 = vpack.c.bf16 %v271_v14, %v269_v13  ;;  %v513_v17 = vld [vmem:[%s3254_s3 + $0x410] sm:$0xff]  ;;  %v516_v13 = vld [vmem:[%s3254_s3 + $0x428] sm:$0xff]  ;;  %v518_v14 = vld [vmem:[%s3254_s3 + $0x438] sm:$0xff] }
 0x11a   :  { %vm217_vm4 = vcmp.ge.f32.partialorder %v195_v7, 0.0 }
 0x11b   :  { %v200_v21 = vpop.f32.mrb[2].mxu0  ;;  %v226_v27 = vmul.f32 0.05, %v197_v20  ;;  %vm218_vm2 = vcmp.ge.f32.partialorder %v197_v20, 0.0 }
 0x11c   :  { %v201_v22 = vadd.f32 %v200_v21, %v116_v16  ;;  %v202_v23 = vpop.f32.mrb[3].mxu0  ;;  %v273_v21 = vld [vmem:[%s3254_s3 + $0x100] sm:$0xff] }
 0x11d   :  { %v203_v24 = vadd.f32 %v202_v23, %v116_v16  ;;  %v234_v42 = vsel %vm218_vm2, %v197_v20, %v226_v27  ;;  %v276_v16 = vld [vmem:[%s3254_s3 + $0x118] sm:$0xff]  ;;  %v278_v23 = vld [vmem:[%s3254_s3 + $0x128] sm:$0xff]  ;;  %v277_v27 = vld [vmem:[%s3254_s3 + $0x120] sm:$0xff] }
 0x11e   :  { %v227_v28 = vmul.f32 0.05, %v201_v22  ;;  %vm219_vm1 = vcmp.ge.f32.partialorder %v201_v22, 0.0  ;;  %v1402_v20 = vpack.c.bf16 %v276_v16, %v274_v15  ;;  %v1438_v16 = vpack.c.bf16 %v518_v14, %v516_v13  ;;  %v837_v13 = vld [vmem:[%s3255_s5 + $0x100] sm:$0xff] }
 0x11f   :  { %vm220_vm0 = vcmp.ge.f32.partialorder %v203_v24, 0.0  ;;  %v228_v31 = vmul.f32 0.05, %v203_v24  ;;  %v2223_v32 = vpop.f32.mrb[4].mxu0  ;;  %v841_v14 = vld [vmem:[%s3255_s5 + $0x120] sm:$0xff] }
 0x120   :  { %v2225_v34 = vpop.f32.mrb[5].mxu0  ;;  %v235_v39 = vsel %vm219_vm1, %v201_v22, %v227_v28  ;;  %v275_v22 = vld [vmem:[%s3254_s3 + $0x110] sm:$0xff] }
 0x121   :  { %v236_v35 = vsel %vm220_vm0, %v203_v24, %v228_v31  ;;  %v280_v24 = vld [vmem:[%s3254_s3 + $0x138] sm:$0xff]  ;;  %v1404_v25 = vpack.c.bf16 %v275_v22, %v273_v21  ;;  %v279_v28 = vld [vmem:[%s3254_s3 + $0x130] sm:$0xff] }
 0x122   :  { %433 = vmatprep.mubr.f32.mxu1 %v236_v35  ;;  %v1406_v26 = vpack.c.bf16 %v280_v24, %v278_v23  ;;  %v1408_v31 = vpack.c.bf16 %v279_v28, %v277_v27  ;;  %v281_v35 = vld [vmem:[%s3254_s3 + $0x140] sm:$0xff]  ;;  %v520_v23 = vld [vmem:[%s3254_s3 + $0x448] sm:$0xff]  ;;  %v522_v24 = vld [vmem:[%s3254_s3 + $0x458] sm:$0xff] }
 0x123   :  { %434 = vmatmul.mubr.f32.vlgmr.msra.gmra.mrb[0].mxu1 %v235_v39  ;;  %v2239_v43 = vpop.f32.mrb[6].mxu0  ;;  %v524_v28 = vld [vmem:[%s3254_s3 + $0x468] sm:$0xff] }
 0x124   :  { %1373 = vmatpush1.bf16.msra.mxu1 %v1372_v33  ;;  %504 = vmatprep.mubr.f32.mxu1 %v234_v42  ;;  %v2241_v45 = vpop.f32.mrb[7].mxu0  ;;  %v1410_v33 = vpack.c.bf16 %v284_v30, %v282_v29  ;;  %v287_v42 = vld [vmem:[%s3254_s3 + $0x170] sm:$0xff]  ;;  %v526_v29 = vld [vmem:[%s3254_s3 + $0x478] sm:$0xff]  ;;  %v806_v30 = vld [vmem:[%s3255_s5 + $0x8] sm:$0xff] }
 0x125   :  { %1375 = vmatprep.subr.bf16.mxu1 %v1374_v36  ;;  %v283_v36 = vld [vmem:[%s3254_s3 + $0x150] sm:$0xff]  ;;  %v1416_v47 = vpack.c.bf16 %v287_v42, %v285_v41  ;;  %v813_v42 = vld [vmem:[%s3255_s5 + $0x40] sm:$0xff] }
 0x126   :  { %v1412_v39 = vpack.c.bf16 %v283_v36, %v281_v35  ;;  %v1442_v35 = vpack.c.bf16 %v522_v24, %v520_v23  ;;  %v1580_v23 = vpack.c.bf16 %v841_v14, %v837_v13  ;;  %v877_v13 = vld [vmem:[%s3255_s5 + $0x240] sm:$0xff] }
 0x127   :  { %v881_v14 = vld [vmem:[%s3255_s5 + $0x260] sm:$0xff] }
 0x128   :  { %1377 = vmatpush1.bf16.msra.mxu1 %v1376_v44  ;;  %v290_v44 = vld [vmem:[%s3254_s3 + $0x188] sm:$0xff] }
 0x129   :  { %1379 = vmatprep.subr.bf16.mxu1 %v1378_v46  ;;  %v292_v46 = vld [vmem:[%s3254_s3 + $0x198] sm:$0xff] }
 0x12a   :  { %v1418_v48 = vpack.c.bf16 %v292_v46, %v290_v44  ;;  %v817_v44 = vld [vmem:[%s3255_s5 + $0x60] sm:$0xff]  ;;  %v822_v46 = vld [vmem:[%s3255_s5 + $0x88] sm:$0xff] }
 0x12c   :  { %1381 = vmatpush1.bf16.msra.mxu1 %v1380_v51  ;;  %v294_v51 = vld [vmem:[%s3254_s3 + $0x1a8] sm:$0xff] }
 0x12d   :  { %1383 = vmatprep.subr.bf16.mxu1 %v1382_v52  ;;  %v296_v52 = vld [vmem:[%s3254_s3 + $0x1b8] sm:$0xff] }
 0x12e   :  { %v1422_v54 = vpack.c.bf16 %v296_v52, %v294_v51  ;;  %v1568_v51 = vpack.c.bf16 %v817_v44, %v813_v42  ;;  %v1446_v52 = vpack.c.bf16 %v526_v29, %v524_v28  ;;  %v849_v28 = vld [vmem:[%s3255_s5 + $0x160] sm:$0xff]  ;;  %v542_v29 = vld [vmem:[%s3254_s3 + $0x4f8] sm:$0xff] }
 0x12f   :  { %v857_v42 = vld [vmem:[%s3255_s5 + $0x1a0] sm:$0xff]  ;;  %v546_v44 = vld [vmem:[%s3254_s3 + $0x518] sm:$0xff] }
 0x130   :  { %1385 = vmatpush1.bf16.msra.mxu1 %v1384_v57  ;;  %v298_v57 = vld [vmem:[%s3254_s3 + $0x1c8] sm:$0xff] }
 0x131   :  { %1387 = vmatprep.subr.bf16.mxu1 %v1386_v58  ;;  %v300_v58 = vld [vmem:[%s3254_s3 + $0x1d8] sm:$0xff] }
 0x132   :  { %v1426_v60 = vpack.c.bf16 %v300_v58, %v298_v57  ;;  %v530_v57 = vld [vmem:[%s3254_s3 + $0x498] sm:$0xff]  ;;  %v830_v58 = vld [vmem:[%s3255_s5 + $0xc8] sm:$0xff] }
 0x134   :  { %1389 = vmatpush1.bf16.msra.mxu1 %v1388_v63  ;;  %v302_v63 = vld [vmem:[%s3254_s3 + $0x1e8] sm:$0xff] }
 0x135   :  { %1391 = vmatprep.subr.bf16.mxu1 %v1390_v0  ;;  %v304_v0 = vld [vmem:[%s3254_s3 + $0x1f8] sm:$0xff] }
 0x136   :  { %v1430_v3 = vpack.c.bf16 %v304_v0, %v302_v63  ;;  %v1572_v63 = vpack.c.bf16 %v825_v56, %v821_v55  ;;  %v861_v55 = vld [vmem:[%s3255_s5 + $0x1c0] sm:$0xff] }
 0x137   :  { %v865_v56 = vld [vmem:[%s3255_s5 + $0x1e0] sm:$0xff] }
 0x138   :  { %1393 = vmatpush1.bf16.msra.mxu1 %v1392_v5  ;;  %v303_v5 = vld [vmem:[%s3254_s3 + $0x1f0] sm:$0xff] }
 0x139   :  { %1395 = vmatprep.subr.bf16.mxu1 %v1394_v6  ;;  %v209_v6 = vadd.f32 %v2225_v34, %v2399_v2  ;;  %v1432_v10 = vpack.c.bf16 %v303_v5, %v301_v4  ;;  %v225_v34 = vmul.f32 0.05, %v195_v7  ;;  %v829_v4 = vld [vmem:[%s3255_s5 + $0xc0] sm:$0xff] }
 0x13a   :  { %v833_v5 = vld [vmem:[%s3255_s5 + $0xe0] sm:$0xff] }
 0x13b   :  { %v230_v18 = vmul.f32 0.05, %v209_v6  ;;  %vm222_vm3 = vcmp.ge.f32.partialorder %v209_v6, 0.0  ;;  %v233_v22 = vsel %vm217_vm4, %v195_v7, %v225_v34  ;;  %v838_v7 = vld [vmem:[%s3255_s5 + $0x108] sm:$0xff] }
 0x13c   :  { %1397 = vmatpush1.bf16.msra.mxu1 %v1396_v11  ;;  %v1434_v11 = vpack.c.bf16 %v514_v9, %v512_v8  ;;  %v842_v8 = vld [vmem:[%s3255_s5 + $0x128] sm:$0xff]  ;;  %v1452_v9 = vpack.c.bf16 %v529_v62, %v527_v61  ;;  %v547_v61 = vld [vmem:[%s3254_s3 + $0x520] sm:$0xff]  ;;  %v549_v62 = vld [vmem:[%s3254_s3 + $0x530] sm:$0xff] }
 0x13d   :  { %1399 = vmatprep.subr.bf16.mxu1 %v1398_v12  ;;  %v511_v12 = vld [vmem:[%s3254_s3 + $0x400] sm:$0xff]  ;;  %v238_v21 = vsel %vm222_vm3, %v209_v6, %v230_v18  ;;  %v534_v6 = vld [vmem:[%s3254_s3 + $0x4b8] sm:$0xff]  ;;  %v536_v18 = vld [vmem:[%s3254_s3 + $0x4c8] sm:$0xff]  ;;  %v1578_v34 = vpack.c.bf16 %v842_v8, %v838_v7 }
 0x13e   :  { %v1436_v15 = vpack.c.bf16 %v513_v17, %v511_v12  ;;  %v1576_v12 = vpack.c.bf16 %v833_v5, %v829_v4  ;;  %v869_v4 = vld [vmem:[%s3255_s5 + $0x200] sm:$0xff]  ;;  %v878_v7 = vld [vmem:[%s3255_s5 + $0x248] sm:$0xff] }
 0x13f   :  { %v873_v5 = vld [vmem:[%s3255_s5 + $0x220] sm:$0xff]  ;;  %v882_v8 = vld [vmem:[%s3255_s5 + $0x268] sm:$0xff] }
 0x140   :  { %1401 = vmatpush1.bf16.msra.mxu1 %v1400_v19  ;;  %v515_v19 = vld [vmem:[%s3254_s3 + $0x420] sm:$0xff] }
 0x141   :  { %1403 = vmatprep.subr.bf16.mxu1 %v1402_v20  ;;  %v517_v20 = vld [vmem:[%s3254_s3 + $0x430] sm:$0xff] }
 0x142   :  { %v1440_v27 = vpack.c.bf16 %v517_v20, %v515_v19  ;;  %v850_v19 = vld [vmem:[%s3255_s5 + $0x168] sm:$0xff] }
 0x144   :  { %1405 = vmatpush1.bf16.msra.mxu1 %v1404_v25  ;;  %v519_v25 = vld [vmem:[%s3254_s3 + $0x440] sm:$0xff] }
 0x145   :  { %1407 = vmatprep.subr.bf16.mxu1 %v1406_v26  ;;  %v521_v26 = vld [vmem:[%s3254_s3 + $0x450] sm:$0xff] }
 0x148   :  { %1409 = vmatpush1.bf16.msra.mxu1 %v1408_v31  ;;  %v810_v31 = vld [vmem:[%s3255_s5 + $0x28] sm:$0xff] }
 0x149   :  { %1411 = vmatprep.subr.bf16.mxu1 %v1410_v33  ;;  %v805_v33 = vld [vmem:[%s3255_s5] sm:$0xff]  ;;  %v1562_v36 = vpack.c.bf16 %v810_v31, %v806_v30  ;;  %v854_v30 = vld [vmem:[%s3255_s5 + $0x188] sm:$0xff] }
 0x14a   :  { %v858_v31 = vld [vmem:[%s3255_s5 + $0x1a8] sm:$0xff] }
 0x14b   :  { %1563 = vmatprep.subr.bf16.mxu0 %v1562_v36  ;;  %v541_v36 = vld [vmem:[%s3254_s3 + $0x4f0] sm:$0xff] }
 0x14c   :  { %1413 = vmatpush1.bf16.msra.mxu1 %v1412_v39  ;;  %v818_v39 = vld [vmem:[%s3255_s5 + $0x68] sm:$0xff] }
 0x14d   :  { %1415 = vmatprep.subr.bf16.mxu1 %v1414_v40  ;;  %v1564_v40 = vpack.c.bf16 %v809_v37, %v805_v33  ;;  %v1566_v41 = vpack.c.bf16 %v818_v39, %v814_v38  ;;  %v544_v39 = vld [vmem:[%s3254_s3 + $0x508] sm:$0xff] }
 0x14f   :  { %1565 = vmatpush1.bf16.msra.mxu0 %v1564_v40  ;;  %v1586_v40 = vpack.c.bf16 %v858_v31, %v854_v30  ;;  %v894_v30 = vld [vmem:[%s3255_s5 + $0x2c8] sm:$0xff] }
 0x150   :  { %1417 = vmatpush1.bf16.msra.mxu1 %v1416_v47  ;;  %v826_v47 = vld [vmem:[%s3255_s5 + $0xa8] sm:$0xff]  ;;  %1567 = vmatprep.subr.bf16.mxu0 %v1566_v41  ;;  %v853_v41 = vld [vmem:[%s3255_s5 + $0x180] sm:$0xff] }
 0x151   :  { %1419 = vmatprep.subr.bf16.mxu1 %v1418_v48  ;;  %v1444_v48 = vpack.c.bf16 %v521_v26, %v519_v25  ;;  %v540_v25 = vld [vmem:[%s3254_s3 + $0x4e8] sm:$0xff] }
 0x152   :  { %v1462_v38 = vpack.c.bf16 %v542_v29, %v540_v25  ;;  %v560_v25 = vld [vmem:[%s3254_s3 + $0x588] sm:$0xff]  ;;  %v562_v29 = vld [vmem:[%s3254_s3 + $0x598] sm:$0xff] }
 0x153   :  { %1569 = vmatpush1.bf16.msra.mxu0 %v1568_v51  ;;  %v1588_v51 = vpack.c.bf16 %v857_v42, %v853_v41  ;;  %v898_v31 = vld [vmem:[%s3255_s5 + $0x2e8] sm:$0xff]  ;;  %v893_v41 = vld [vmem:[%s3255_s5 + $0x2c0] sm:$0xff] }
 0x154   :  { %1421 = vmatpush1.bf16.msra.mxu1 %v1420_v53  ;;  %v528_v53 = vld [vmem:[%s3254_s3 + $0x488] sm:$0xff]  ;;  %v897_v42 = vld [vmem:[%s3255_s5 + $0x2e0] sm:$0xff] }
 0x155   :  { %1423 = vmatprep.subr.bf16.mxu1 %v1422_v54  ;;  %v1570_v54 = vpack.c.bf16 %v826_v47, %v822_v46  ;;  %v1450_v0 = vpack.c.bf16 %v530_v57, %v528_v53  ;;  %v862_v46 = vld [vmem:[%s3255_s5 + $0x1c8] sm:$0xff]  ;;  %v550_v57 = vld [vmem:[%s3254_s3 + $0x538] sm:$0xff] }
 0x156   :  { %v866_v47 = vld [vmem:[%s3255_s5 + $0x1e8] sm:$0xff] }
 0x157   :  { %1571 = vmatprep.subr.bf16.mxu0 %v1570_v54  ;;  %v548_v53 = vld [vmem:[%s3254_s3 + $0x528] sm:$0xff]  ;;  %v1590_v54 = vpack.c.bf16 %v866_v47, %v862_v46 }
 0x158   :  { %1425 = vmatpush1.bf16.msra.mxu1 %v1424_v59  ;;  %v834_v59 = vld [vmem:[%s3255_s5 + $0xe8] sm:$0xff]  ;;  %1573 = vmatpush1.bf16.msra.mxu0 %v1572_v63  ;;  %v1592_v63 = vpack.c.bf16 %v865_v56, %v861_v55  ;;  %v901_v55 = vld [vmem:[%s3255_s5 + $0x300] sm:$0xff] }
 0x159   :  { %1427 = vmatprep.subr.bf16.mxu1 %v1426_v60  ;;  %v1448_v60 = vpack.c.bf16 %v525_v50, %v523_v49  ;;  %v543_v49 = vld [vmem:[%s3254_s3 + $0x500] sm:$0xff]  ;;  %v545_v50 = vld [vmem:[%s3254_s3 + $0x510] sm:$0xff]  ;;  %v902_v46 = vld [vmem:[%s3255_s5 + $0x308] sm:$0xff] }
 0x15a   :  { %v906_v47 = vld [vmem:[%s3255_s5 + $0x328] sm:$0xff]  ;;  %v905_v56 = vld [vmem:[%s3255_s5 + $0x320] sm:$0xff] }
 0x15c   :  { %1429 = vmatpush1.bf16.msra.mxu1 %v1428_v1  ;;  %v532_v1 = vld [vmem:[%s3254_s3 + $0x4a8] sm:$0xff] }
 0x15d   :  { %1431 = vmatprep.subr.bf16.mxu1 %v1430_v3  ;;  %v1574_v3 = vpack.c.bf16 %v834_v59, %v830_v58  ;;  %v1454_v17 = vpack.c.bf16 %v534_v6, %v532_v1  ;;  %v870_v58 = vld [vmem:[%s3255_s5 + $0x208] sm:$0xff]  ;;  %v554_v6 = vld [vmem:[%s3254_s3 + $0x558] sm:$0xff] }
 0x15e   :  { %v874_v59 = vld [vmem:[%s3255_s5 + $0x228] sm:$0xff] }
 0x15f   :  { %1575 = vmatprep.subr.bf16.mxu0 %v1574_v3  ;;  %v552_v1 = vld [vmem:[%s3254_s3 + $0x548] sm:$0xff]  ;;  %v1594_v3 = vpack.c.bf16 %v874_v59, %v870_v58 }
 0x160   :  { %1433 = vmatpush1.bf16.msra.mxu1 %v1432_v10  ;;  %v531_v10 = vld [vmem:[%s3254_s3 + $0x4a0] sm:$0xff]  ;;  %1577 = vmatpush1.bf16.msra.mxu0 %v1576_v12  ;;  %v1596_v12 = vpack.c.bf16 %v873_v5, %v869_v4  ;;  %v910_v58 = vld [vmem:[%s3255_s5 + $0x348] sm:$0xff] }
 0x161   :  { %1435 = vmatprep.subr.bf16.mxu1 %v1434_v11  ;;  %v533_v11 = vld [vmem:[%s3254_s3 + $0x4b0] sm:$0xff]  ;;  %1579 = vmatprep.subr.bf16.mxu0 %v1578_v34  ;;  %v1598_v34 = vpack.c.bf16 %v882_v8, %v878_v7  ;;  %v914_v59 = vld [vmem:[%s3255_s5 + $0x368] sm:$0xff]  ;;  %v909_v4 = vld [vmem:[%s3255_s5 + $0x340] sm:$0xff] }
 0x162   :  { %v1456_v20 = vpack.c.bf16 %v533_v11, %v531_v10  ;;  %v551_v10 = vld [vmem:[%s3254_s3 + $0x540] sm:$0xff]  ;;  %v553_v11 = vld [vmem:[%s3254_s3 + $0x550] sm:$0xff]  ;;  %v918_v7 = vld [vmem:[%s3255_s5 + $0x388] sm:$0xff] }
 0x163   :  { %505 = vmatmul.mubr.f32.vlgmr.msra.gmra.mrb[0].mxu1 %v233_v22  ;;  %v537_v22 = vld [vmem:[%s3254_s3 + $0x4d0] sm:$0xff]  ;;  %v913_v5 = vld [vmem:[%s3255_s5 + $0x360] sm:$0xff]  ;;  %v922_v8 = vld [vmem:[%s3255_s5 + $0x3a8] sm:$0xff] }
 0x164   :  { %1437 = vmatpush1.bf16.msra.mxu1 %v1436_v15  ;;  %639 = vmatprep.mubr.f32.mxu1 %v238_v21  ;;  %v538_v15 = vld [vmem:[%s3254_s3 + $0x4d8] sm:$0xff]  ;;  %v535_v21 = vld [vmem:[%s3254_s3 + $0x4c0] sm:$0xff] }
 0x165   :  { %1439 = vmatprep.subr.bf16.mxu1 %v1438_v16  ;;  %v846_v16 = vld [vmem:[%s3255_s5 + $0x148] sm:$0xff]  ;;  %v1458_v24 = vpack.c.bf16 %v538_v15, %v536_v18  ;;  %v1460_v33 = vpack.c.bf16 %v537_v22, %v535_v21  ;;  %1581 = vmatpush1.bf16.msra.mxu0 %v1580_v23  ;;  %v558_v15 = vld [vmem:[%s3254_s3 + $0x578] sm:$0xff]  ;;  %v555_v21 = vld [vmem:[%s3254_s3 + $0x560] sm:$0xff]  ;;  %v1600_v23 = vpack.c.bf16 %v881_v14, %v877_v13 }
 0x166   :  { %v1582_v26 = vpack.c.bf16 %v850_v19, %v846_v16  ;;  %v556_v18 = vld [vmem:[%s3254_s3 + $0x568] sm:$0xff]  ;;  %v557_v22 = vld [vmem:[%s3254_s3 + $0x570] sm:$0xff]  ;;  %v207_v13 = vadd.f32 %v2223_v32, %v2399_v2  ;;  %v648_v32 = vld [vmem:[%s3254_s3 + $0x600] sm:$0xff] }
 0x167   :  { %v886_v16 = vld [vmem:[%s3255_s5 + $0x288] sm:$0xff]  ;;  %v650_v2 = vld [vmem:[%s3254_s3 + $0x610] sm:$0xff] }
 0x168   :  { %1441 = vmatpush1.bf16.msra.mxu1 %v1440_v27  ;;  %v845_v27 = vld [vmem:[%s3255_s5 + $0x140] sm:$0xff]  ;;  %1583 = vmatprep.subr.bf16.mxu0 %v1582_v26  ;;  %v890_v19 = vld [vmem:[%s3255_s5 + $0x2a8] sm:$0xff]  ;;  %vm221_vm5 = vcmp.ge.f32.partialorder %v207_v13, 0.0 }
 0x169   :  { %1443 = vmatprep.subr.bf16.mxu1 %v1442_v35  ;;  %v539_v35 = vld [vmem:[%s3254_s3 + $0x4e0] sm:$0xff]  ;;  %v1584_v37 = vpack.c.bf16 %v849_v28, %v845_v27  ;;  %v1602_v26 = vpack.c.bf16 %v890_v19, %v886_v16  ;;  %v649_v14 = vld [vmem:[%s3254_s3 + $0x608] sm:$0xff] }
 0x16a   :  { %v885_v27 = vld [vmem:[%s3255_s5 + $0x280] sm:$0xff] }
 0x16b   :  { %1585 = vmatpush1.bf16.msra.mxu0 %v1584_v37  ;;  %v889_v28 = vld [vmem:[%s3255_s5 + $0x2a0] sm:$0xff] }
 0x16c   :  { %1445 = vmatpush1.bf16.msra.mxu1 %v1444_v48  ;;  %v1464_v48 = vpack.c.bf16 %v541_v36, %v539_v35  ;;  %1587 = vmatprep.subr.bf16.mxu0 %v1586_v40  ;;  %v559_v35 = vld [vmem:[%s3254_s3 + $0x580] sm:$0xff]  ;;  %v561_v36 = vld [vmem:[%s3254_s3 + $0x590] sm:$0xff]  ;;  %v1604_v37 = vpack.c.bf16 %v889_v28, %v885_v27  ;;  %v1606_v40 = vpack.c.bf16 %v898_v31, %v894_v30  ;;  %v659_v30 = vld [vmem:[%s3254_s3 + $0x658] sm:$0xff] }
 0x16d   :  { %1447 = vmatprep.subr.bf16.mxu1 %v1446_v52  ;;  %v1466_v52 = vpack.c.bf16 %v546_v44, %v544_v39  ;;  %v564_v39 = vld [vmem:[%s3254_s3 + $0x5a8] sm:$0xff]  ;;  %v566_v44 = vld [vmem:[%s3254_s3 + $0x5b8] sm:$0xff]  ;;  %v654_v27 = vld [vmem:[%s3254_s3 + $0x630] sm:$0xff] }
 0x16f   :  { %1589 = vmatpush1.bf16.msra.mxu0 %v1588_v51  ;;  %v1608_v51 = vpack.c.bf16 %v897_v42, %v893_v41  ;;  %v660_v42 = vld [vmem:[%s3254_s3 + $0x660] sm:$0xff] }
 0x170   :  { %1449 = vmatpush1.bf16.msra.mxu1 %v1448_v60  ;;  %v1468_v60 = vpack.c.bf16 %v545_v50, %v543_v49  ;;  %1591 = vmatprep.subr.bf16.mxu0 %v1590_v54  ;;  %v563_v49 = vld [vmem:[%s3254_s3 + $0x5a0] sm:$0xff]  ;;  %v565_v50 = vld [vmem:[%s3254_s3 + $0x5b0] sm:$0xff]  ;;  %v1610_v54 = vpack.c.bf16 %v906_v47, %v902_v46  ;;  %v665_v46 = vld [vmem:[%s3254_s3 + $0x688] sm:$0xff] }
 0x171   :  { %1451 = vmatprep.subr.bf16.mxu1 %v1450_v0  ;;  %v1470_v0 = vpack.c.bf16 %v550_v57, %v548_v53  ;;  %v568_v53 = vld [vmem:[%s3254_s3 + $0x5c8] sm:$0xff]  ;;  %v570_v57 = vld [vmem:[%s3254_s3 + $0x5d8] sm:$0xff] }
 0x172   :  { %v667_v47 = vld [vmem:[%s3254_s3 + $0x698] sm:$0xff] }
 0x173   :  { %1593 = vmatpush1.bf16.msra.mxu0 %v1592_v63  ;;  %v1612_v63 = vpack.c.bf16 %v905_v56, %v901_v55  ;;  %v668_v56 = vld [vmem:[%s3254_s3 + $0x6a0] sm:$0xff] }
 0x174   :  { %1453 = vmatpush1.bf16.msra.mxu1 %v1452_v9  ;;  %v1472_v9 = vpack.c.bf16 %v549_v62, %v547_v61  ;;  %1595 = vmatprep.subr.bf16.mxu0 %v1594_v3  ;;  %v567_v61 = vld [vmem:[%s3254_s3 + $0x5c0] sm:$0xff]  ;;  %v569_v62 = vld [vmem:[%s3254_s3 + $0x5d0] sm:$0xff]  ;;  %v1614_v3 = vpack.c.bf16 %v914_v59, %v910_v58  ;;  %v673_v58 = vld [vmem:[%s3254_s3 + $0x6c8] sm:$0xff] }
 0x175   :  { %1455 = vmatprep.subr.bf16.mxu1 %v1454_v17  ;;  %v1474_v17 = vpack.c.bf16 %v554_v6, %v552_v1  ;;  %v572_v1 = vld [vmem:[%s3254_s3 + $0x5e8] sm:$0xff]  ;;  %v574_v6 = vld [vmem:[%s3254_s3 + $0x5f8] sm:$0xff] }
 0x176   :  { %v675_v59 = vld [vmem:[%s3254_s3 + $0x6d8] sm:$0xff] }
 0x177   :  { %1597 = vmatpush1.bf16.msra.mxu0 %v1596_v12  ;;  %v1494_v12 = vpack.c.bf16 %v574_v6, %v572_v1  ;;  %v679_v1 = vld [vmem:[%s3254_s3 + $0x6f8] sm:$0xff]  ;;  %v678_v6 = vld [vmem:[%s3254_s3 + $0x6f0] sm:$0xff] }
 0x178   :  { %1457 = vmatpush1.bf16.msra.mxu1 %v1456_v20  ;;  %v1476_v20 = vpack.c.bf16 %v553_v11, %v551_v10  ;;  %1599 = vmatprep.subr.bf16.mxu0 %v1598_v34  ;;  %v1492_v10 = vpack.c.bf16 %v569_v62, %v567_v61  ;;  %v1616_v11 = vpack.c.bf16 %v913_v5, %v909_v4  ;;  %v672_v62 = vld [vmem:[%s3254_s3 + $0x6c0] sm:$0xff] }
 0x179   :  { %1459 = vmatprep.subr.bf16.mxu1 %v1458_v24  ;;  %v1478_v24 = vpack.c.bf16 %v558_v15, %v556_v18  ;;  %v573_v18 = vld [vmem:[%s3254_s3 + $0x5f0] sm:$0xff]  ;;  %v1618_v34 = vpack.c.bf16 %v922_v8, %v918_v7  ;;  %v651_v15 = vld [vmem:[%s3254_s3 + $0x618] sm:$0xff]  ;;  %v1522_v61 = vpack.c.bf16 %v675_v59, %v673_v58  ;;  %v676_v5 = vld [vmem:[%s3254_s3 + $0x6e0] sm:$0xff] }
 0x17a   :  { %v681_v7 = vld [vmem:[%s3254_s3 + $0x708] sm:$0xff]  ;;  %v683_v8 = vld [vmem:[%s3254_s3 + $0x718] sm:$0xff] }
 0x17b   :  { %1601 = vmatpush1.bf16.msra.mxu0 %v1600_v23 }
 0x17c   :  { %1461 = vmatpush1.bf16.msra.mxu1 %v1460_v33  ;;  %v1480_v33 = vpack.c.bf16 %v557_v22, %v555_v21  ;;  %1603 = vmatprep.subr.bf16.mxu0 %v1602_v26  ;;  %v229_v21 = vmul.f32 0.05, %v207_v13  ;;  %v653_v22 = vld [vmem:[%s3254_s3 + $0x628] sm:$0xff]  ;;  %v652_v26 = vld [vmem:[%s3254_s3 + $0x620] sm:$0xff] }
 0x17d   :  { %1463 = vmatprep.subr.bf16.mxu1 %v1462_v38  ;;  %v1482_v38 = vpack.c.bf16 %v562_v29, %v560_v25  ;;  %v657_v29 = vld [vmem:[%s3254_s3 + $0x648] sm:$0xff] }
 0x17e   :  { %v237_v28 = vsel %vm221_vm5, %v207_v13, %v229_v21  ;;  %v688_v21 = vld [vmem:[%s3254_s3 + $0x740] sm:$0xff] }
 0x17f   :  { %1605 = vmatpush1.bf16.msra.mxu0 %v1604_v37  ;;  %v658_v37 = vld [vmem:[%s3254_s3 + $0x650] sm:$0xff] }
 0x180   :  { %1465 = vmatpush1.bf16.msra.mxu1 %v1464_v48  ;;  %v1484_v48 = vpack.c.bf16 %v561_v36, %v559_v35  ;;  %1607 = vmatprep.subr.bf16.mxu0 %v1606_v40  ;;  %v1506_v35 = vpack.c.bf16 %v659_v30, %v657_v29  ;;  %v656_v36 = vld [vmem:[%s3254_s3 + $0x640] sm:$0xff]  ;;  %v699_v29 = vld [vmem:[%s3254_s3 + $0x798] sm:$0xff] }
 0x181   :  { %1467 = vmatprep.subr.bf16.mxu1 %v1466_v52  ;;  %v1486_v52 = vpack.c.bf16 %v566_v44, %v564_v39  ;;  %v663_v39 = vld [vmem:[%s3254_s3 + $0x678] sm:$0xff]  ;;  %v1508_v40 = vpack.c.bf16 %v658_v37, %v656_v36  ;;  %v662_v44 = vld [vmem:[%s3254_s3 + $0x670] sm:$0xff]  ;;  %v701_v36 = vld [vmem:[%s3254_s3 + $0x7a8] sm:$0xff] }
 0x182   :  { %v703_v37 = vld [vmem:[%s3254_s3 + $0x7b8] sm:$0xff] }
 0x183   :  { %1609 = vmatpush1.bf16.msra.mxu0 %v1608_v51  ;;  %v666_v51 = vld [vmem:[%s3254_s3 + $0x690] sm:$0xff] }
 0x184   :  { %1469 = vmatpush1.bf16.msra.mxu1 %v1468_v60  ;;  %v1488_v60 = vpack.c.bf16 %v565_v50, %v563_v49  ;;  %1611 = vmatprep.subr.bf16.mxu0 %v1610_v54  ;;  %v1514_v49 = vpack.c.bf16 %v667_v47, %v665_v46  ;;  %v664_v50 = vld [vmem:[%s3254_s3 + $0x680] sm:$0xff] }
 0x185   :  { %1471 = vmatprep.subr.bf16.mxu1 %v1470_v0  ;;  %v1490_v0 = vpack.c.bf16 %v570_v57, %v568_v53  ;;  %v671_v53 = vld [vmem:[%s3254_s3 + $0x6b8] sm:$0xff]  ;;  %v1516_v54 = vpack.c.bf16 %v666_v51, %v664_v50  ;;  %v670_v57 = vld [vmem:[%s3254_s3 + $0x6b0] sm:$0xff]  ;;  %v709_v50 = vld [vmem:[%s3254_s3 + $0x7e8] sm:$0xff] }
 0x186   :  { %v711_v51 = vld [vmem:[%s3254_s3 + $0x7f8] sm:$0xff] }
 0x187   :  { %1613 = vmatpush1.bf16.msra.mxu0 %v1612_v63  ;;  %v674_v63 = vld [vmem:[%s3254_s3 + $0x6d0] sm:$0xff] }
 0x188   :  { %1473 = vmatpush1.bf16.msra.mxu1 %v1472_v9  ;;  %v2771_v9 = vpop.permute.xlu1 %125  ;;  %1615 = vmatprep.subr.bf16.mxu0 %v1614_v3  ;;  %v1524_v3 = vpack.c.bf16 %v674_v63, %v672_v62 }
 0x189   :  { %1475 = vmatprep.subr.bf16.mxu1 %v1474_v17  ;;  %v571_v17 = vld [vmem:[%s3254_s3 + $0x5e0] sm:$0xff]  ;;  %v215_v16 = vadd.f32 %v2241_v45, %v2771_v9  ;;  %v655_v45 = vld [vmem:[%s3254_s3 + $0x638] sm:$0xff] }
 0x18a   :  { %v1496_v19 = vpack.c.bf16 %v573_v18, %v571_v17  ;;  %v1502_v25 = vpack.c.bf16 %v655_v45, %v653_v22  ;;  %v682_v17 = vld [vmem:[%s3254_s3 + $0x710] sm:$0xff]  ;;  %v685_v18 = vld [vmem:[%s3254_s3 + $0x728] sm:$0xff] }
 0x18b   :  { %1617 = vmatpush1.bf16.msra.mxu0 %v1616_v11  ;;  %v232_v23 = vmul.f32 0.05, %v215_v16  ;;  %vm224_vm6 = vcmp.ge.f32.partialorder %v215_v16, 0.0  ;;  %v1530_v11 = vpack.c.bf16 %v683_v8, %v681_v7  ;;  %v690_v22 = vld [vmem:[%s3254_s3 + $0x750] sm:$0xff]  ;;  %v693_v45 = vld [vmem:[%s3254_s3 + $0x768] sm:$0xff]  ;;  %v787_v7 = vlaneseq }
 0x18c   :  { %1477 = vmatpush1.bf16.msra.mxu1 %v1476_v20  ;;  %v1498_v20 = vpack.c.bf16 %v651_v15, %v649_v14  ;;  %1619 = vmatprep.subr.bf16.mxu0 %v1618_v34  ;;  %v687_v34 = vld [vmem:[%s3254_s3 + $0x738] sm:$0xff]  ;;  %v684_v15 = vld [vmem:[%s3254_s3 + $0x720] sm:$0xff] }
 0x18d   :  { %1479 = vmatprep.subr.bf16.mxu1 %v1478_v24  ;;  %v1500_v24 = vpack.c.bf16 %v650_v2, %v648_v32  ;;  %v240_v31 = vsel %vm224_vm6, %v215_v16, %v232_v23  ;;  %v1534_v14 = vpack.c.bf16 %v687_v34, %v685_v18  ;;  %v686_v16 = vld [vmem:[%s3254_s3 + $0x730] sm:$0xff]  ;;  %v695_v23 = vld [vmem:[%s3254_s3 + $0x778] sm:$0xff]  ;;  %v788_v8 = vshrl.u32 %v787_v7, 7 }
 0x18e   :  { %v1536_v32 = vpack.c.bf16 %v686_v16, %v684_v15  ;;  %v807_v16 = vld [vmem:[%s3255_s5 + $0x10] sm:$0xff] }
 0x18f   :  { %v875_v7 = vld [vmem:[%s3255_s5 + $0x230] sm:$0xff] }
 0x190   :  { %1481 = vmatpush1.bf16.msra.mxu1 %v1480_v33  ;;  %v1504_v33 = vpack.c.bf16 %v654_v27, %v652_v26  ;;  %v692_v26 = vld [vmem:[%s3254_s3 + $0x760] sm:$0xff]  ;;  %v694_v27 = vld [vmem:[%s3254_s3 + $0x770] sm:$0xff] }
 0x191   :  { %1483 = vmatprep.subr.bf16.mxu1 %v1482_v38  ;;  %v661_v38 = vld [vmem:[%s3254_s3 + $0x668] sm:$0xff]  ;;  %v1544_v30 = vpack.c.bf16 %v694_v27, %v692_v26  ;;  %v824_v27 = vld [vmem:[%s3255_s5 + $0x98] sm:$0xff] }
 0x192   :  { %v1510_v41 = vpack.c.bf16 %v663_v39, %v661_v38  ;;  %v1550_v39 = vpack.c.bf16 %v703_v37, %v701_v36  ;;  %v836_v36 = vld [vmem:[%s3255_s5 + $0xf8] sm:$0xff] }
 0x194   :  { %1485 = vmatpush1.bf16.msra.mxu1 %v1484_v48  ;;  %v1512_v48 = vpack.c.bf16 %v662_v44, %v660_v42  ;;  %v705_v42 = vld [vmem:[%s3254_s3 + $0x7c8] sm:$0xff]  ;;  %v707_v44 = vld [vmem:[%s3254_s3 + $0x7d8] sm:$0xff] }
 0x195   :  { %1487 = vmatprep.subr.bf16.mxu1 %v1486_v52  ;;  %v669_v52 = vld [vmem:[%s3254_s3 + $0x6a8] sm:$0xff]  ;;  %v1554_v47 = vpack.c.bf16 %v707_v44, %v705_v42  ;;  %v844_v42 = vld [vmem:[%s3255_s5 + $0x138] sm:$0xff] }
 0x196   :  { %v1518_v55 = vpack.c.bf16 %v671_v53, %v669_v52  ;;  %v1558_v53 = vpack.c.bf16 %v711_v51, %v709_v50  ;;  %v852_v50 = vld [vmem:[%s3255_s5 + $0x178] sm:$0xff] }
 0x198   :  { %1489 = vmatpush1.bf16.msra.mxu1 %v1488_v60  ;;  %v1520_v60 = vpack.c.bf16 %v670_v57, %v668_v56  ;;  %v213_v56 = vadd.f32 %v2239_v43, %v2771_v9  ;;  %v926_v43 = vld [vmem:[%s3255_s5 + $0x3c8] sm:$0xff] }
 0x199   :  { %1491 = vmatprep.subr.bf16.mxu1 %v1490_v0  ;;  %v677_v0 = vld [vmem:[%s3254_s3 + $0x6e8] sm:$0xff] }
 0x19a   :  { %v1526_v4 = vpack.c.bf16 %v679_v1, %v677_v0  ;;  %v231_v58 = vmul.f32 0.05, %v213_v56  ;;  %vm223_vm7 = vcmp.ge.f32.partialorder %v213_v56, 0.0  ;;  %v930_v9 = vld [vmem:[%s3255_s5 + $0x3e8] sm:$0xff]  ;;  %v925_v0 = vld [vmem:[%s3255_s5 + $0x3c0] sm:$0xff] }
 0x19b   :  { %v1622_v63 = vpack.c.bf16 %v930_v9, %v926_v43  ;;  %v929_v1 = vld [vmem:[%s3255_s5 + $0x3e0] sm:$0xff] }
 0x19c   :  { %1493 = vmatpush1.bf16.msra.mxu1 %v1492_v10  ;;  %v1528_v10 = vpack.c.bf16 %v678_v6, %v676_v5  ;;  %v239_v59 = vsel %vm223_vm7, %v213_v56, %v231_v58  ;;  %v812_v5 = vld [vmem:[%s3255_s5 + $0x38] sm:$0xff] }
 0x19d   :  { %1495 = vmatprep.subr.bf16.mxu1 %v1494_v12  ;;  %v680_v12 = vld [vmem:[%s3254_s3 + $0x700] sm:$0xff]  ;;  %v860_v56 = vld [vmem:[%s3255_s5 + $0x1b8] sm:$0xff] }
 0x19e   :  { %v1532_v13 = vpack.c.bf16 %v682_v17, %v680_v12  ;;  %v793_v12 = vsub.s32 1, %v788_v8 }
 0x1a0   :  { %1497 = vmatpush1.bf16.msra.mxu1 %v1496_v19  ;;  %v689_v19 = vld [vmem:[%s3254_s3 + $0x748] sm:$0xff] }
 0x1a1   :  { %1499 = vmatprep.subr.bf16.mxu1 %v1498_v20  ;;  %v691_v20 = vld [vmem:[%s3254_s3 + $0x758] sm:$0xff] }
 0x1a2   :  { %v1538_v2 = vpack.c.bf16 %v691_v20, %v689_v19  ;;  %v811_v19 = vld [vmem:[%s3255_s5 + $0x30] sm:$0xff] }
 0x1a3   :  { %640 = vmatmul.mubr.f32.vlgmr.msra.gmra.mrb[0].mxu1 %v237_v28  ;;  %v697_v28 = vld [vmem:[%s3254_s3 + $0x788] sm:$0xff] }
 0x1a4   :  { %1501 = vmatpush1.bf16.msra.mxu1 %v1500_v24  ;;  %776 = vmatprep.mubr.f32.mxu1 %v240_v31  ;;  %v1540_v24 = vpack.c.bf16 %v690_v22, %v688_v21  ;;  %v1546_v31 = vpack.c.bf16 %v699_v29, %v697_v28  ;;  %v1628_v22 = vpack.c.bf16 %v811_v19, %v807_v16  ;;  %v828_v28 = vld [vmem:[%s3255_s5 + $0xb8] sm:$0xff]  ;;  %v887_v16 = vld [vmem:[%s3255_s5 + $0x290] sm:$0xff] }
 0x1a5   :  { %1503 = vmatprep.subr.bf16.mxu1 %v1502_v25  ;;  %v1542_v25 = vpack.c.bf16 %v695_v23, %v693_v45  ;;  %v891_v19 = vld [vmem:[%s3255_s5 + $0x2b0] sm:$0xff] }
 0x1a8   :  { %1505 = vmatpush1.bf16.msra.mxu1 %v1504_v33  ;;  %v696_v33 = vld [vmem:[%s3254_s3 + $0x780] sm:$0xff] }
 0x1a9   :  { %1507 = vmatprep.subr.bf16.mxu1 %v1506_v35  ;;  %v698_v35 = vld [vmem:[%s3254_s3 + $0x790] sm:$0xff] }
 0x1aa   :  { %v1548_v38 = vpack.c.bf16 %v698_v35, %v696_v33  ;;  %v827_v33 = vld [vmem:[%s3255_s5 + $0xb0] sm:$0xff]  ;;  %v832_v35 = vld [vmem:[%s3255_s5 + $0xd8] sm:$0xff] }
 0x1ac   :  { %1509 = vmatpush1.bf16.msra.mxu1 %v1508_v40  ;;  %v700_v40 = vld [vmem:[%s3254_s3 + $0x7a0] sm:$0xff] }
 0x1ad   :  { %1511 = vmatprep.subr.bf16.mxu1 %v1510_v41  ;;  %v702_v41 = vld [vmem:[%s3254_s3 + $0x7b0] sm:$0xff] }
 0x1ae   :  { %v1552_v46 = vpack.c.bf16 %v702_v41, %v700_v40  ;;  %v835_v40 = vld [vmem:[%s3255_s5 + $0xf0] sm:$0xff]  ;;  %v840_v41 = vld [vmem:[%s3255_s5 + $0x118] sm:$0xff] }
 0x1b0   :  { %1513 = vmatpush1.bf16.msra.mxu1 %v1512_v48  ;;  %v704_v48 = vld [vmem:[%s3254_s3 + $0x7c0] sm:$0xff] }
 0x1b1   :  { %1515 = vmatprep.subr.bf16.mxu1 %v1514_v49  ;;  %v706_v49 = vld [vmem:[%s3254_s3 + $0x7d0] sm:$0xff] }
 0x1b2   :  { %v1556_v52 = vpack.c.bf16 %v706_v49, %v704_v48  ;;  %v843_v48 = vld [vmem:[%s3255_s5 + $0x130] sm:$0xff]  ;;  %v848_v49 = vld [vmem:[%s3255_s5 + $0x158] sm:$0xff] }
 0x1b4   :  { %1517 = vmatpush1.bf16.msra.mxu1 %v1516_v54  ;;  %v708_v54 = vld [vmem:[%s3254_s3 + $0x7e0] sm:$0xff] }
 0x1b5   :  { %1519 = vmatprep.subr.bf16.mxu1 %v1518_v55  ;;  %v710_v55 = vld [vmem:[%s3254_s3 + $0x7f0] sm:$0xff] }
 0x1b6   :  { %v1560_v57 = vpack.c.bf16 %v710_v55, %v708_v54  ;;  %v851_v54 = vld [vmem:[%s3255_s5 + $0x170] sm:$0xff]  ;;  %v856_v55 = vld [vmem:[%s3255_s5 + $0x198] sm:$0xff] }
 0x1b7   :  { %v1650_v58 = vpack.c.bf16 %v860_v56, %v856_v55  ;;  %v1090_v55 = vld [vmem:[%s3257_s7 + $0x8] sm:$0xff]  ;;  %v1091_v56 = vld [vmem:[%s3257_s7 + $0x10] sm:$0xff] }
 0x1b8   :  { %1521 = vmatpush1.bf16.msra.mxu1 %v1520_v60  ;;  %v917_v60 = vld [vmem:[%s3255_s5 + $0x380] sm:$0xff] }
 0x1b9   :  { %1523 = vmatprep.subr.bf16.mxu1 %v1522_v61  ;;  %v921_v61 = vld [vmem:[%s3255_s5 + $0x3a0] sm:$0xff] }
 0x1ba   :  { %v1620_v62 = vpack.c.bf16 %v921_v61, %v917_v60  ;;  %v859_v60 = vld [vmem:[%s3255_s5 + $0x1b0] sm:$0xff]  ;;  %v864_v61 = vld [vmem:[%s3255_s5 + $0x1d8] sm:$0xff] }
 0x1bc   :  { %1525 = vmatpush1.bf16.msra.mxu1 %v1524_v3  ;;  %1621 = vmatpush1.bf16.msra.mxu0 %v1620_v62  ;;  %v1624_v3 = vpack.c.bf16 %v929_v1, %v925_v0  ;;  %v868_v62 = vld [vmem:[%s3255_s5 + $0x1f8] sm:$0xff]  ;;  %v867_v0 = vld [vmem:[%s3255_s5 + $0x1f0] sm:$0xff] }
 0x1bd   :  { %1527 = vmatprep.subr.bf16.mxu1 %v1526_v4  ;;  %1623 = vmatprep.subr.bf16.mxu0 %v1622_v63  ;;  %v808_v4 = vld [vmem:[%s3255_s5 + $0x18] sm:$0xff]  ;;  %v1654_v9 = vpack.c.bf16 %v868_v62, %v864_v61  ;;  %v863_v63 = vld [vmem:[%s3255_s5 + $0x1d0] sm:$0xff] }
 0x1be   :  { %v1626_v6 = vpack.c.bf16 %v812_v5, %v808_v4  ;;  %v872_v1 = vld [vmem:[%s3255_s5 + $0x218] sm:$0xff]  ;;  %v1656_v4 = vpack.c.bf16 %v867_v0, %v863_v63  ;;  %v1095_v62 = vld [vmem:[%s3257_s7 + $0x30] sm:$0xff]  ;;  %v1097_v63 = vld [vmem:[%s3257_s7 + $0x40] sm:$0xff] }
 0x1bf   :  { %v1098_v0 = vld [vmem:[%s3257_s7 + $0x48] sm:$0xff] }
 0x1c0   :  { %1529 = vmatpush1.bf16.msra.mxu1 %v1528_v10  ;;  %1625 = vmatpush1.bf16.msra.mxu0 %v1624_v3  ;;  %v789_v10 = vsub.s32 0, %v788_v8  ;;  %v876_v3 = vld [vmem:[%s3255_s5 + $0x238] sm:$0xff] }
 0x1c1   :  { %1531 = vmatprep.subr.bf16.mxu1 %v1530_v11  ;;  %1627 = vmatprep.subr.bf16.mxu0 %v1626_v6  ;;  %v785_v11 = vld [vmem:[%s3256_s4] sm:$0x3]  ;;  %v1658_v5 = vpack.c.bf16 %v876_v3, %v872_v1  ;;  %v871_v6 = vld [vmem:[%s3255_s5 + $0x210] sm:$0xff]  ;;  %v880_v8 = vld [vmem:[%s3255_s5 + $0x258] sm:$0xff]  ;;  %v1703_v1 = vpack.c.bf16 %v1098_v0, %v1097_v63 }
 0x1c2   :  { %v790_v17 = vrot.slane %v785_v11, %v789_v10  ;;  %v794_v18 = vrot.slane %v785_v11, %v793_v12  ;;  %v884_v10 = vld [vmem:[%s3255_s5 + $0x278] sm:$0xff]  ;;  %v1660_v11 = vpack.c.bf16 %v875_v7, %v871_v6  ;;  %v1099_v3 = vld [vmem:[%s3257_s7 + $0x50] sm:$0xff]  ;;  %v1101_v6 = vld [vmem:[%s3257_s7 + $0x60] sm:$0xff] }
 0x1c3   :  { %v1662_v12 = vpack.c.bf16 %v884_v10, %v880_v8  ;;  %v1102_v7 = vld [vmem:[%s3257_s7 + $0x68] sm:$0xff]  ;;  %v1103_v10 = vld [vmem:[%s3257_s7 + $0x70] sm:$0xff] }
 0x1c4   :  { %1533 = vmatpush1.bf16.msra.mxu1 %v1532_v13  ;;  %v1709_v8 = vpack.c.bf16 %v1102_v7, %v1101_v6 }
 0x1c5   :  { %1535 = vmatprep.subr.bf16.mxu1 %v1534_v14 }
 0x1c8   :  { %1537 = vmatpush1.bf16.msra.mxu1 %v1536_v32  ;;  %v816_v32 = vld [vmem:[%s3255_s5 + $0x58] sm:$0xff] }
 0x1c9   :  { %1539 = vmatprep.subr.bf16.mxu1 %v1538_v2  ;;  %v820_v2 = vld [vmem:[%s3255_s5 + $0x78] sm:$0xff] }
 0x1ca   :  { %v1630_v23 = vpack.c.bf16 %v820_v2, %v816_v32  ;;  %v900_v32 = vld [vmem:[%s3255_s5 + $0x2f8] sm:$0xff]  ;;  %v1668_v2 = vpack.c.bf16 %v891_v19, %v887_v16  ;;  %v1188_v19 = vld [vmem:[%s3258_s6] ss:$0 sm:$0xff] }
 0x1cc   :  { %1541 = vmatpush1.bf16.msra.mxu1 %v1540_v24  ;;  %v815_v24 = vld [vmem:[%s3255_s5 + $0x50] sm:$0xff] }
 0x1cd   :  { %1543 = vmatprep.subr.bf16.mxu1 %v1542_v25  ;;  %v819_v25 = vld [vmem:[%s3255_s5 + $0x70] sm:$0xff] }
 0x1ce   :  { %v1632_v29 = vpack.c.bf16 %v819_v25, %v815_v24  ;;  %v908_v24 = vld [vmem:[%s3255_s5 + $0x338] sm:$0xff] }
 0x1d0   :  { %1545 = vmatpush1.bf16.msra.mxu1 %v1544_v30  ;;  %v1634_v30 = vpack.c.bf16 %v828_v28, %v824_v27  ;;  %v903_v28 = vld [vmem:[%s3255_s5 + $0x310] sm:$0xff] }
 0x1d1   :  { %1547 = vmatprep.subr.bf16.mxu1 %v1546_v31  ;;  %v823_v31 = vld [vmem:[%s3255_s5 + $0x90] sm:$0xff] }
 0x1d2   :  { %v1636_v37 = vpack.c.bf16 %v827_v33, %v823_v31  ;;  %v916_v31 = vld [vmem:[%s3255_s5 + $0x378] sm:$0xff] }
 0x1d4   :  { %1549 = vmatpush1.bf16.msra.mxu1 %v1548_v38  ;;  %v1638_v38 = vpack.c.bf16 %v836_v36, %v832_v35  ;;  %v911_v36 = vld [vmem:[%s3255_s5 + $0x350] sm:$0xff] }
 0x1d5   :  { %1551 = vmatprep.subr.bf16.mxu1 %v1550_v39  ;;  %v831_v39 = vld [vmem:[%s3255_s5 + $0xd0] sm:$0xff] }
 0x1d6   :  { %v1640_v44 = vpack.c.bf16 %v835_v40, %v831_v39  ;;  %v924_v39 = vld [vmem:[%s3255_s5 + $0x3b8] sm:$0xff] }
 0x1d8   :  { %1553 = vmatpush1.bf16.msra.mxu1 %v1552_v46  ;;  %v1642_v46 = vpack.c.bf16 %v844_v42, %v840_v41  ;;  %v919_v42 = vld [vmem:[%s3255_s5 + $0x390] sm:$0xff] }
 0x1d9   :  { %1555 = vmatprep.subr.bf16.mxu1 %v1554_v47  ;;  %v839_v47 = vld [vmem:[%s3255_s5 + $0x110] sm:$0xff] }
 0x1da   :  { %v1644_v51 = vpack.c.bf16 %v843_v48, %v839_v47  ;;  %v932_v47 = vld [vmem:[%s3255_s5 + $0x3f8] sm:$0xff] }
 0x1dc   :  { %1557 = vmatpush1.bf16.msra.mxu1 %v1556_v52  ;;  %v1646_v52 = vpack.c.bf16 %v852_v50, %v848_v49  ;;  %v927_v50 = vld [vmem:[%s3255_s5 + $0x3d0] sm:$0xff] }
 0x1dd   :  { %1559 = vmatprep.subr.bf16.mxu1 %v1558_v53  ;;  %v847_v53 = vld [vmem:[%s3255_s5 + $0x150] sm:$0xff] }
 0x1e0   :  { %1561 = vmatpush1.bf16.msra.mxu1 %v1560_v57  ;;  %v1648_v57 = vpack.c.bf16 %v851_v54, %v847_v53  ;;  %v1727_v53 = vmov 0.0|0.0   ;;  %v1089_v54 = vld [vmem:[%s3257_s7] sm:$0xff] }
 0x1e3   :  { %777 = vmatmul.mubr.f32.vlgmr.msra.gmra.mrb[0].mxu1 %v239_v59  ;;  %v855_v59 = vld [vmem:[%s3255_s5 + $0x190] sm:$0xff] }
 0x1e4   :  { %v1652_v43 = vpack.c.bf16 %v859_v60, %v855_v59  ;;  %v1093_v59 = vld [vmem:[%s3257_s7 + $0x20] sm:$0xff]  ;;  %v1094_v60 = vld [vmem:[%s3257_s7 + $0x28] sm:$0xff] }
 0x1e5   :  { %v1697_v61 = vpack.c.bf16 %v1094_v60, %v1093_v59 }
 0x2b6   :  { %v778_v34 = vpop.f32.mrb[0].mxu1 }
 0x2b7   :  { %v797_v13 = vadd.f32 %v790_v17, %v778_v34  ;;  %v780_v14 = vpop.f32.mrb[1].mxu1  ;;  %v879_v17 = vld [vmem:[%s3255_s5 + $0x250] sm:$0xff]  ;;  %v888_v34 = vld [vmem:[%s3255_s5 + $0x298] sm:$0xff] }
 0x2b8   :  { %v798_v15 = vadd.f32 %v794_v18, %v780_v14  ;;  %v883_v18 = vld [vmem:[%s3255_s5 + $0x270] sm:$0xff] }
 0x2b9   :  { %v801_v20 = vmul.f32 0.05, %v797_v13  ;;  %vm799_vm8 = vcmp.ge.f32.partialorder %v797_v13, 0.0  ;;  %v1664_v14 = vpack.c.bf16 %v883_v18, %v879_v17  ;;  %v1729_v17 = vmov 0.0  }
 0x2ba   :  { %v802_v21 = vmul.f32 0.05, %v798_v15  ;;  %vm800_vm9 = vcmp.ge.f32.partialorder %v798_v15, 0.0 }
 0x2bb   :  { %v3022_v26 = vsel %vm799_vm8, %v797_v13, %v801_v20  ;;  %v892_v13 = vld [vmem:[%s3255_s5 + $0x2b8] sm:$0xff] }
 0x2bc   :  { %v804_v45 = vsel %vm800_vm9, %v798_v15, %v802_v21  ;;  %v1666_v15 = vpack.c.bf16 %v892_v13, %v888_v34  ;;  %v896_v20 = vld [vmem:[%s3255_s5 + $0x2d8] sm:$0xff] }
 0x2bd   :  { %997 = vmatprep.mubr.f32.mxu0 %v804_v45  ;;  %v1670_v21 = vpack.c.bf16 %v900_v32, %v896_v20 }
 0x2be   :  { %998 = vmatmul.mubr.f32.vlgmr.msra.gmra.mrb[8].mxu0 %v3022_v26 }
 0x2bf   :  { %1629 = vmatpush1.bf16.msra.mxu0 %v1628_v22  ;;  %1068 = vmatprep.mubr.f32.mxu0 %v804_v45  ;;  %v895_v22 = vld [vmem:[%s3255_s5 + $0x2d0] sm:$0xff] }
 0x2c0   :  { %1631 = vmatprep.subr.bf16.mxu0 %v1630_v23  ;;  %v899_v45 = vld [vmem:[%s3255_s5 + $0x2f0] sm:$0xff]  ;;  %v904_v23 = vld [vmem:[%s3255_s5 + $0x318] sm:$0xff] }
 0x2c1   :  { %v1672_v25 = vpack.c.bf16 %v899_v45, %v895_v22  ;;  %v1674_v27 = vpack.c.bf16 %v908_v24, %v904_v23  ;;  %v1189_v22 = vld [vmem:[%s3259_s8] ss:$0 sm:$0xff] }
 0x2c3   :  { %1633 = vmatpush1.bf16.msra.mxu0 %v1632_v29  ;;  %v907_v29 = vld [vmem:[%s3255_s5 + $0x330] sm:$0xff] }
 0x2c4   :  { %1635 = vmatprep.subr.bf16.mxu0 %v1634_v30  ;;  %v912_v30 = vld [vmem:[%s3255_s5 + $0x358] sm:$0xff]  ;;  %v1676_v33 = vpack.c.bf16 %v907_v29, %v903_v28 }
 0x2c5   :  { %v1678_v35 = vpack.c.bf16 %v916_v31, %v912_v30 }
 0x2c7   :  { %1637 = vmatpush1.bf16.msra.mxu0 %v1636_v37  ;;  %v915_v37 = vld [vmem:[%s3255_s5 + $0x370] sm:$0xff] }
 0x2c8   :  { %1639 = vmatprep.subr.bf16.mxu0 %v1638_v38  ;;  %v920_v38 = vld [vmem:[%s3255_s5 + $0x398] sm:$0xff]  ;;  %v1680_v40 = vpack.c.bf16 %v915_v37, %v911_v36 }
 0x2c9   :  { %v1682_v41 = vpack.c.bf16 %v924_v39, %v920_v38 }
 0x2cb   :  { %1641 = vmatpush1.bf16.msra.mxu0 %v1640_v44  ;;  %v923_v44 = vld [vmem:[%s3255_s5 + $0x3b0] sm:$0xff] }
 0x2cc   :  { %1643 = vmatprep.subr.bf16.mxu0 %v1642_v46  ;;  %v928_v46 = vld [vmem:[%s3255_s5 + $0x3d8] sm:$0xff]  ;;  %v1684_v48 = vpack.c.bf16 %v923_v44, %v919_v42 }
 0x2cd   :  { %v1686_v49 = vpack.c.bf16 %v932_v47, %v928_v46 }
 0x2cf   :  { %1645 = vmatpush1.bf16.msra.mxu0 %v1644_v51  ;;  %v931_v51 = vld [vmem:[%s3255_s5 + $0x3f0] sm:$0xff] }
 0x2d0   :  { %1647 = vmatprep.subr.bf16.mxu0 %v1646_v52  ;;  %v1688_v52 = vpack.c.bf16 %v931_v51, %v927_v50 }
 0x2d3   :  { %1649 = vmatpush1.bf16.msra.mxu0 %v1648_v57  ;;  %v1691_v57 = vpack.c.bf16 %v1090_v55, %v1089_v54 }
 0x2d4   :  { %1651 = vmatprep.subr.bf16.mxu0 %v1650_v58  ;;  %v1092_v58 = vld [vmem:[%s3257_s7 + $0x18] sm:$0xff] }
 0x2d7   :  { %1653 = vmatpush1.bf16.msra.mxu0 %v1652_v43  ;;  %v1096_v43 = vld [vmem:[%s3257_s7 + $0x38] sm:$0xff] }
 0x2d8   :  { %1655 = vmatprep.subr.bf16.mxu0 %v1654_v9  ;;  %v1700_v9 = vpack.c.bf16 %v1096_v43, %v1095_v62 }
 0x2db   :  { %1657 = vmatpush1.bf16.msra.mxu0 %v1656_v4  ;;  %v1100_v4 = vld [vmem:[%s3257_s7 + $0x58] sm:$0xff] }
 0x2dc   :  { %1659 = vmatprep.subr.bf16.mxu0 %v1658_v5  ;;  %v1706_v5 = vpack.c.bf16 %v1100_v4, %v1099_v3 }
 0x2df   :  { %1661 = vmatpush1.bf16.msra.mxu0 %v1660_v11  ;;  %v1104_v11 = vld [vmem:[%s3257_s7 + $0x78] sm:$0xff] }
 0x2e0   :  { %1663 = vmatprep.subr.bf16.mxu0 %v1662_v12  ;;  %v1712_v12 = vpack.c.bf16 %v1104_v11, %v1103_v10 }
 0x2e3   :  { %1665 = vmatpush1.bf16.msra.mxu0 %v1664_v14 }
 0x2e4   :  { %1667 = vmatprep.subr.bf16.mxu0 %v1666_v15 }
 0x2e7   :  { %1669 = vmatpush1.bf16.msra.mxu0 %v1668_v2 }
 0x2e8   :  { %1671 = vmatprep.subr.bf16.mxu0 %v1670_v21 }
 0x2eb   :  { %1673 = vmatpush1.bf16.msra.mxu0 %v1672_v25 }
 0x2ec   :  { %1675 = vmatprep.subr.bf16.mxu0 %v1674_v27 }
 0x2ef   :  { %1677 = vmatpush1.bf16.msra.mxu0 %v1676_v33 }
 0x2f0   :  { %1679 = vmatprep.subr.bf16.mxu0 %v1678_v35 }
 0x2f3   :  { %1681 = vmatpush1.bf16.msra.mxu0 %v1680_v40 }
 0x2f4   :  { %1683 = vmatprep.subr.bf16.mxu0 %v1682_v41 }
 0x2f7   :  { %1685 = vmatpush1.bf16.msra.mxu0 %v1684_v48 }
 0x2f8   :  { %1687 = vmatprep.subr.bf16.mxu0 %v1686_v49 }
 0x2fb   :  { %1689 = vmatpush1.bf16.msra.mxu0 %v1688_v52 }
 0x2fc   :  { %1690 = vmatprep.subr.bf16.mxu0 %v1727_v53 }
 0x2fe   :  { %1069 = vmatmul.mubr.f32.vlgmr.msra.gmra.mrb[10].mxu0 %v3022_v26  ;;  %v1694_v26 = vpack.c.bf16 %v1092_v58, %v1091_v56 }
 0x2ff   :  { %1692 = vmatpush3.bf16.msra.mxu0 %v1691_v57  ;;  %1239 = vmatprep.mubr.msk.f32.mxu0 %vm1728_vm10, %v1729_v17 }
 0x300   :  { %1693 = vmatprep.subr.bf16.mxu0 %v1727_v53 }
 0x303   :  { %1695 = vmatpush3.bf16.msra.mxu0 %v1694_v26 }
 0x304   :  { %1696 = vmatprep.subr.bf16.mxu0 %v1727_v53 }
 0x307   :  { %1698 = vmatpush3.bf16.msra.mxu0 %v1697_v61 }
 0x308   :  { %1699 = vmatprep.subr.bf16.mxu0 %v1727_v53 }
 0x30b   :  { %1701 = vmatpush3.bf16.msra.mxu0 %v1700_v9 }
 0x30c   :  { %1702 = vmatprep.subr.bf16.mxu0 %v1727_v53 }
 0x30f   :  { %1704 = vmatpush3.bf16.msra.mxu0 %v1703_v1 }
 0x310   :  { %1705 = vmatprep.subr.bf16.mxu0 %v1727_v53 }
 0x313   :  { %1707 = vmatpush3.bf16.msra.mxu0 %v1706_v5 }
 0x314   :  { %1708 = vmatprep.subr.bf16.mxu0 %v1727_v53 }
 0x317   :  { %1710 = vmatpush3.bf16.msra.mxu0 %v1709_v8 }
 0x318   :  { %1711 = vmatprep.subr.bf16.mxu0 %v1727_v53 }
 0x31b   :  { %1713 = vmatpush3.bf16.msra.mxu0 %v1712_v12 }
 0x391   :  { %v999_v18 = vpop.f32.mrb[8].mxu0 }
 0x392   :  { %v1001_v34 = vpop.f32.mrb[9].mxu0 }
 0x393   :  { %v1075_v13 = vmax.f32 %v999_v18, %v1001_v34 }
 0x3d1   :  { %v1070_v14 = vpop.f32.mrb[10].mxu0 }
 0x3d2   :  { %v1072_v15 = vpop.f32.mrb[11].mxu0 }
 0x3d3   :  { %v1076_v16 = vmax.f32 %v1070_v14, %v1072_v15 }
 0x3d5   :  { %v1077_v20 = vmax.f32 %v1075_v13, %v1076_v16 }
 0x3d7   :  { %v1085_v32 = vadd.f32 %v1188_v19, %v1077_v20 }
 0x3d9   :  { %vm1086_vm11 = vcmp.ge.f32.partialorder %v1085_v32, 0.0  ;;  %v1087_v2 = vmul.f32 0.05, %v1085_v32 }
 0x3db   :  { %v1088_v21 = vsel %vm1086_vm11, %v1085_v32, %v1087_v2 }
 0x3dc   :  { %1240 = vmatmul.mubr.f32.vlgmr.msra.gmra.mrb[12].mxu0 %v1088_v21 }
 0x4af   :  { %v1178_v45 = vpop.f32.mrb[12].mxu0 }
 0x4b0   :  { %v1179_v23 = vadd.f32 %v1189_v22, %v1178_v45  ;;  %v1241_v24 = vpop.f32.mrb[13].mxu0 }
 0x4b2   :  { %1183 = vst.msk [vmem:[%s3260_s9] sm:$0xff] %vm1182_vm12, %v1179_v23 }

</bundles_post_ra>
